<compile_context>
chip_gen: v7x
topology: tpu7x:2x2x1
jax: 0.10.0
libtpu: 0.0.40
codegen_flags: <defaults>
</compile_context>

<pallas_src>
import functools

import jax
import jax.numpy as jnp
from jax.experimental import pallas as pl
from jax.experimental.pallas import tpu as pltpu

NUM_GROUPS = 8
EPS = 1e-6


# --------------------------------------------------------------------------- #
# Device-aware helpers                                                         #
# --------------------------------------------------------------------------- #
def _tpu_vmem_capacity():
    try:
        return int(pltpu.get_tpu_info().vmem_capacity_bytes)
    except Exception:
        return 64 * 1024 * 1024        # conservative (v7x per-TC VMEM)


def _vmem_limit(bytes_est):
    """Scoped-VMEM request: estimate + margin, clamped to ~75% of physical VMEM."""
    ceiling = int(_tpu_vmem_capacity() * 0.75)
    return int(min(max(int(1.3 * bytes_est), 32 * 1024 * 1024), ceiling))


def _pick_tile(n, target):
    """Largest tile <= target that divides n and is a multiple of 8 (else n)."""
    if n <= target:
        return n
    for t in range(target - target % 8, 7, -8):
        if n % t == 0:
            return t
    return n


def _bspec(shape, index_map, buffers=None):
    """BlockSpec with optional pipeline-depth override (single-buffer grid-invariant
    operands and the once-read residual to reclaim VMEM)."""
    if buffers is not None:
        try:
            return pl.BlockSpec(shape, index_map, pipeline_mode=pl.Buffered(buffers))
        except TypeError:              # fallback if pipeline_mode kwarg unavailable
            pass
    return pl.BlockSpec(shape, index_map)


# --------------------------------------------------------------------------- #
# Kernel 1: GroupNorm statistics -> per-channel scale / shift                  #
# --------------------------------------------------------------------------- #
def gn_stats_kernel(x_ref, gamma_ref, beta_ref, g_ref, gt_ref,
                    sc_ref, sh_ref, *, n_total):
    n = pl.program_id(1)

    @pl.when(n == 0)
    def _():
        sc_ref[...] = jnp.zeros_like(sc_ref)
        sh_ref[...] = jnp.zeros_like(sh_ref)

    x = x_ref[0].astype(jnp.float32)                                  # [tn, C]
    sc_ref[0] = sc_ref[0] + jnp.sum(x, axis=0, keepdims=True)         # running sum
    sh_ref[0] = sh_ref[0] + jnp.sum(x * x, axis=0, keepdims=True)     # running sumsq

    @pl.when(n == pl.num_programs(1) - 1)
    def _():
        gsize = x_ref.shape[-1] // NUM_GROUPS
        cnt = jnp.float32(n_total * gsize)
        sum_c = sc_ref[0]                                             # [1, C]
        sumsq_c = sh_ref[0]                                           # [1, C]
        mean_g = jnp.dot(sum_c, g_ref[...],
                         preferred_element_type=jnp.float32) / cnt    # [1, NG]
        ex2_g = jnp.dot(sumsq_c, g_ref[...],
                        preferred_element_type=jnp.float32) / cnt     # [1, NG]
        # E[x^2]-E[x]^2 can cancel slightly negative in f32 -> clamp.
        # TODO(synk): switch to a mean-centered second pass if parity tightens.
        var_g = jnp.maximum(ex2_g - mean_g * mean_g, 0.0)
        inv_g = jax.lax.rsqrt(var_g + EPS)
        mean_c = jnp.dot(mean_g, gt_ref[...],
                         preferred_element_type=jnp.float32)          # [1, C]
        inv_c = jnp.dot(inv_g, gt_ref[...],
                        preferred_element_type=jnp.float32)           # [1, C]
        scale_c = gamma_ref[...] * inv_c
        shift_c = beta_ref[...] - mean_c * scale_c
        sc_ref[0] = scale_c
        sh_ref[0] = shift_c


# --------------------------------------------------------------------------- #
# Kernel 2: fused normalize + single [C, 3C] q/k/v projection (bf16 MXU)       #
# --------------------------------------------------------------------------- #
def qkv_kernel(x_ref, sc_ref, sh_ref, wqkv_ref, bqkv_ref, q_ref, k_ref, v_ref):
    x = x_ref[0].astype(jnp.float32)                                  # [tn, C]
    h = (x * sc_ref[0] + sh_ref[0]).astype(jnp.bfloat16)              # GroupNorm FMA
    c = q_ref.shape[-1]
    # one wide [tn, 3C] MXU matmul instead of three narrow [tn, C] ones
    qkv = jnp.dot(h, wqkv_ref[...],
                  preferred_element_type=jnp.float32) + bqkv_ref[...]
    q_ref[0] = qkv[:, :c].astype(jnp.bfloat16)        # 1/sqrt(C) already in wq/bq
    k_ref[0] = qkv[:, c:2 * c].astype(jnp.bfloat16)
    v_ref[0] = qkv[:, 2 * c:].astype(jnp.bfloat16)


# --------------------------------------------------------------------------- #
# Kernel 3: attention (tiled over softmax-row axis j) + proj_out + residual    #
# --------------------------------------------------------------------------- #
def attn_kernel(x_ref, q_ref, k_ref, v_ref, wp_ref, bp_ref, o_ref):
    j = pl.program_id(1)

    @pl.when(j == 0)
    def _():
        o_ref[...] = jnp.zeros_like(o_ref)

    qj = q_ref[0]                                                     # [tj, C] bf16 (pre-scaled)
    kall = k_ref[0]                                                   # [N,  C] bf16
    # scores s[r, i] = q_{j*tj+r} . k_i    (rows j..j+tj of the [N, N] matrix)
    s = jax.lax.dot_general(qj, kall, (((1,), (1,)), ((), ())),
                            preferred_element_type=jnp.float32)       # [tj, N]
    m = jnp.max(s, axis=-1, keepdims=True)
    p = jnp.exp(s - m)                                                # [tj, N]
    inv = pl.reciprocal(jnp.sum(p, axis=-1, keepdims=True), approx=True)  # [tj, 1]
    # Per-row softmax scale is contracted away -> apply it to v ([tj, C])
    # instead of p ([tj, N]): N/C fewer VALU multiplies per step.
    v_scaled = (v_ref[0].astype(jnp.float32) * inv).astype(jnp.bfloat16)  # [tj, C]
    # out[i, c] += sum_r p[r, i] * v_scaled[r, c]  (contract dim 0, no transpose)
    contrib = jax.lax.dot_general(p.astype(jnp.bfloat16), v_scaled,
                                  (((0,), (0,)), ((), ())),
                                  preferred_element_type=jnp.float32)  # [N, C]
    o_ref[0] = o_ref[0] + contrib

    @pl.when(j == pl.num_programs(1) - 1)
    def _():
        out = o_ref[0].astype(jnp.bfloat16)                           # [N, C]
        y = jnp.dot(out, wp_ref[...],
                    preferred_element_type=jnp.float32) + bp_ref[...]
        o_ref[0] = x_ref[0] + y                                       # residual


# --------------------------------------------------------------------------- #
# Wrapper                                                                      #
# --------------------------------------------------------------------------- #
def _attn_block_pallas_impl(x_nchw, params):
    B, C, H, W = x_nchw.shape
    N = H * W
    # TODO(synk): NCHW<->NHWC conversion stays as XLA transposes (PyTorch-layout
    # parity only; drop if the surrounding model runs NHWC).
    x_bnc = jnp.transpose(x_nchw, (0, 2, 3, 1)).reshape(B, N, C)

    gidx = jnp.arange(C) // (C // NUM_GROUPS)
    G = jax.nn.one_hot(gidx, NUM_GROUPS, dtype=jnp.float32)           # [C, NG]
    Gt = jnp.transpose(G)                                             # [NG, C]

    # Tile targets per generation: 512 when VMEM >= ~96 MiB (v5e/v6e 128 MiB),
    # 256 under the 64 MiB v7x budget.
    tile_target = 512 if _tpu_vmem_capacity() >= 96 * 1024 * 1024 else 256
    tn = _pick_tile(N, tile_target)     # token tile for stats / projections
    tj = _pick_tile(N, tile_target)     # softmax-row tile for attention
    n_tiles = N // tn
    j_tiles = N // tj

    bf16 = jnp.bfloat16
    f32b, bf16b = 4, 2

    # Fold 1/sqrt(C) into wq/bq (f32, before the bf16 cast) and fuse q/k/v into
    # a single [C, 3C] weight / [1, 3C] bias.
    qscale = jnp.float32(float(C) ** -0.5)
    wqkv = jnp.concatenate(
        [params["wq"] * qscale, params["wk"], params["wv"]], axis=1).astype(bf16)
    bqkv = jnp.concatenate(
        [params["bq"] * qscale, params["bk"], params["bv"]], axis=1)  # f32
    wp = params["wp"].astype(bf16)

    # ---- pass 1: GroupNorm per-channel scale/shift ------------------------- #
    sc, sh = pl.pallas_call(
        functools.partial(gn_stats_kernel, n_total=N),
        out_shape=(jax.ShapeDtypeStruct((B, 1, C), jnp.float32),
                   jax.ShapeDtypeStruct((B, 1, C), jnp.float32)),
        grid_spec=pltpu.PrefetchScalarGridSpec(
            num_scalar_prefetch=0,
            grid=(B, n_tiles),
            in_specs=[
                pl.BlockSpec((1, tn, C), lambda b, n: (b, n, 0)),          # x
                _bspec((1, C), lambda b, n: (0, 0), buffers=1),            # gamma
                _bspec((1, C), lambda b, n: (0, 0), buffers=1),            # beta
                _bspec((C, NUM_GROUPS), lambda b, n: (0, 0), buffers=1),   # G
                _bspec((NUM_GROUPS, C), lambda b, n: (0, 0), buffers=1),   # G^T
            ],
            out_specs=[
                pl.BlockSpec((1, 1, C), lambda b, n: (b, 0, 0)),
                pl.BlockSpec((1, 1, C), lambda b, n: (b, 0, 0)),
            ],
        ),
        compiler_params=pltpu.CompilerParams(
            dimension_semantics=("parallel", "arbitrary"),
            vmem_limit_bytes=_vmem_limit(2 * tn * C * f32b + 16 * C * f32b)),
        cost_estimate=pl.CostEstimate(
            flops=3 * B * N * C, transcendentals=0,
            bytes_accessed=B * N * C * f32b + 2 * B * C * f32b),
    )(x_bnc, params["gamma"], params["beta"], G, Gt)

    # ---- pass 2: normalize + fused q/k/v projection (bf16 into the MXU) ---- #
    q_s, k_s, v_s = pl.pallas_call(
        qkv_kernel,
        out_shape=(jax.ShapeDtypeStruct((B, N, C), bf16),
                   jax.ShapeDtypeStruct((B, N, C), bf16),
                   jax.ShapeDtypeStruct((B, N, C), bf16)),
        grid_spec=pltpu.PrefetchScalarGridSpec(
            num_scalar_prefetch=0,
            grid=(B, n_tiles),
            in_specs=[
                pl.BlockSpec((1, tn, C), lambda b, n: (b, n, 0)),          # x
                pl.BlockSpec((1, 1, C), lambda b, n: (b, 0, 0)),           # scale
                pl.BlockSpec((1, 1, C), lambda b, n: (b, 0, 0)),           # shift
                _bspec((C, 3 * C), lambda b, n: (0, 0), buffers=1),        # wqkv
                _bspec((1, 3 * C), lambda b, n: (0, 0), buffers=1),        # bqkv
            ],
            out_specs=[
                pl.BlockSpec((1, tn, C), lambda b, n: (b, n, 0)),
                pl.BlockSpec((1, tn, C), lambda b, n: (b, n, 0)),
                pl.BlockSpec((1, tn, C), lambda b, n: (b, n, 0)),
            ],
        ),
        compiler_params=pltpu.CompilerParams(
            dimension_semantics=("parallel", "parallel"),
            vmem_limit_bytes=_vmem_limit(
                2 * tn * C * f32b                   # x (double-buffered)
                + 3 * C * C * bf16b + 3 * C * f32b  # fused weight/bias (single)
                + 2 * 3 * tn * C * bf16b            # q/k/v outputs (double)
                + 4 * tn * C * f32b)),              # f32 intermediates
        cost_estimate=pl.CostEstimate(
            flops=6 * B * N * C * C, transcendentals=0,
            bytes_accessed=B * N * C * f32b + 3 * B * N * C * bf16b
            + 3 * C * C * bf16b),
    )(x_bnc, sc, sh, wqkv, bqkv)

    # ---- pass 3: attention + proj_out + residual --------------------------- #
    # TODO(synk): for B == 1 on v7x, split the j reduction across the two
    # TensorCores (per-core partial accumulators) to keep both MXUs busy.
    y_bnc = pl.pallas_call(
        attn_kernel,
        out_shape=jax.ShapeDtypeStruct((B, N, C), jnp.float32),
        grid_spec=pltpu.PrefetchScalarGridSpec(
            num_scalar_prefetch=0,
            grid=(B, j_tiles),
            in_specs=[
                # residual x: read once per batch (last j step) -> single-buffer
                _bspec((1, N, C), lambda b, j: (b, 0, 0), buffers=1),      # x
                pl.BlockSpec((1, tj, C), lambda b, j: (b, j, 0)),          # q rows
                pl.BlockSpec((1, N, C), lambda b, j: (b, 0, 0)),           # k (all)
                pl.BlockSpec((1, tj, C), lambda b, j: (b, j, 0)),          # v rows
                _bspec((C, C), lambda b, j: (0, 0), buffers=1),            # wp
                _bspec((1, C), lambda b, j: (0, 0), buffers=1),            # bp
            ],
            out_specs=pl.BlockSpec((1, N, C), lambda b, j: (b, 0, 0)),
        ),
        compiler_params=pltpu.CompilerParams(
            dimension_semantics=("parallel", "arbitrary"),
            vmem_limit_bytes=_vmem_limit(
                N * C * f32b                    # residual x (single-buffered)
                + 2 * N * C * f32b              # output accumulator (double)
                + 2 * N * C * bf16b             # k (double)
                + 4 * tj * C * bf16b            # q/v tiles (double)
                + C * C * bf16b                 # wp (single)
                + tj * N * (f32b + bf16b))),    # score slab + bf16 cast
        cost_estimate=pl.CostEstimate(
            flops=4 * B * N * N * C + 2 * B * N * C * C,
            transcendentals=B * N * N,
            bytes_accessed=2 * B * N * C * f32b + 3 * B * N * C * bf16b
            + C * C * bf16b),
        input_output_aliases={0: 0},   # y overwrites the [B, N, C] x staging buffer
    )(x_bnc, q_s, k_s, v_s, wp, params["bp"])

    return jnp.transpose(y_bnc.reshape(B, H, W, C), (0, 3, 1, 2))


attn_block_pallas = jax.jit(_attn_block_pallas_impl)


# --------------------------------------------------------------------------- #
# Pure-JAX f32 reference (mirrors the PyTorch forward exactly)                 #
# --------------------------------------------------------------------------- #
def attn_block_reference(x_nchw, params):
    B, C, H, W = x_nchw.shape
    N = H * W
    x = jnp.transpose(x_nchw, (0, 2, 3, 1)).reshape(B, N, C)          # [B, N, C]
    gs = C // NUM_GROUPS
    xg = x.reshape(B, N, NUM_GROUPS, gs)
    mean = jnp.mean(xg, axis=(1, 3), keepdims=True)
    var = jnp.mean((xg - mean) ** 2, axis=(1, 3), keepdims=True)
    h = ((xg - mean) / jnp.sqrt(var + EPS)).reshape(B, N, C)
    h = h * params["gamma"] + params["beta"]
    q = h @ params["wq"] + params["bq"]
    k = h @ params["wk"] + params["bk"]
    v = h @ params["wv"] + params["bv"]
    s = jnp.einsum("bic,bjc->bij", q, k) * (int(C) ** (-0.5))
    attn = jax.nn.softmax(s, axis=-1)
    out = jnp.einsum("bji,bjc->bic", attn, v)   # matches bmm(v, w_) without permute
    y = out @ params["wp"] + params["bp"]
    y = x + y
    return jnp.transpose(y.reshape(B, H, W, C), (0, 3, 1, 2))


def make_params(key, C):
    """Deterministic synthetic parameters; conv weights pre-transposed [C_in, C_out]."""
    ks = jax.random.split(key, 10)
    scale = 1.0 / jnp.sqrt(jnp.float32(C))

    def w(k):
        return jax.random.normal(k, (C, C), jnp.float32) * scale

    def b(k):
        return jax.random.normal(k, (1, C), jnp.float32) * 0.1

    return {
        "gamma": 1.0 + 0.1 * jax.random.normal(ks[0], (1, C), jnp.float32),
        "beta": 0.1 * jax.random.normal(ks[1], (1, C), jnp.float32),
        "wq": w(ks[2]), "bq": b(ks[3]),
        "wk": w(ks[4]), "bk": b(ks[5]),
        "wv": w(ks[6]), "bv": b(ks[7]),
        "wp": w(ks[8]), "bp": b(ks[9]),
    }


if __name__ == "__main__":
    B, C, H, W = 2, 32, 8, 8   # C must be divisible by num_groups=8
    key = jax.random.PRNGKey(0)
    kx, kp = jax.random.split(key)
    x = jax.random.normal(kx, (B, C, H, W), jnp.float32)
    params = make_params(kp, C)

    y = jax.block_until_ready(attn_block_pallas(x, params))
    y_ref = jax.block_until_ready(attn_block_reference(x, params))

    assert y.shape == (B, C, H, W)
    # bf16 MXU operands -> compare with bf16-appropriate tolerances
    err = jnp.abs(y - y_ref)
    tol = 5e-2 + 8e-2 * jnp.abs(y_ref)
    assert bool(jnp.all(err <= tol)), float(jnp.max(err))

    print("KERNEL_OK")
</pallas_src>

<mosaic_0001>
module attributes {stable_mosaic.version = 11 : i64} {
  func.func @qkv_kernel(%arg0: i32, %arg1: i32, %arg2: memref<1x64x32xf32, #tpu.memory_space<vmem>>, %arg3: memref<1x1x32xf32, #tpu.memory_space<vmem>>, %arg4: memref<1x1x32xf32, #tpu.memory_space<vmem>>, %arg5: memref<32x96xbf16, #tpu.memory_space<vmem>>, %arg6: memref<1x96xf32, #tpu.memory_space<vmem>>, %arg7: memref<1x64x32xbf16, #tpu.memory_space<vmem>>, %arg8: memref<1x64x32xbf16, #tpu.memory_space<vmem>>, %arg9: memref<1x64x32xbf16, #tpu.memory_space<vmem>>) attributes {dimension_semantics = [#tpu.dimension_semantics<parallel>, #tpu.dimension_semantics<parallel>], iteration_bounds = array<i64: 2, 1>, scalar_prefetch = 0 : i64, scratch_operands = 0 : i64, tpu.core_type = #tpu.core_type<tc>, window_params = [{transform_indices = @transform_0, window_bounds = array<i64: 1, 64, 32>}, {transform_indices = @transform_1, window_bounds = array<i64: 1, 1, 32>}, {transform_indices = @transform_2, window_bounds = array<i64: 1, 1, 32>}, {pipeline_mode = #tpu.pipeline_mode<synchronous>, transform_indices = @transform_3, window_bounds = array<i64: 32, 96>}, {pipeline_mode = #tpu.pipeline_mode<synchronous>, transform_indices = @transform_4, window_bounds = array<i64: 1, 96>}, {transform_indices = @transform_5, window_bounds = array<i64: 1, 64, 32>}, {transform_indices = @transform_6, window_bounds = array<i64: 1, 64, 32>}, {transform_indices = @transform_7, window_bounds = array<i64: 1, 64, 32>}]} {
    %c0 = arith.constant 0 : index
    %c0_0 = arith.constant 0 : index
    %c0_1 = arith.constant 0 : index
    %0 = vector.load %arg2[%c0, %c0_0, %c0_1] : memref<1x64x32xf32, #tpu.memory_space<vmem>>, vector<1x64x32xf32>
    %1 = vector.shape_cast %0 : vector<1x64x32xf32> to vector<64x32xf32>
    %c0_2 = arith.constant 0 : index
    %c0_3 = arith.constant 0 : index
    %c0_4 = arith.constant 0 : index
    %2 = vector.load %arg3[%c0_2, %c0_3, %c0_4] : memref<1x1x32xf32, #tpu.memory_space<vmem>>, vector<1x1x32xf32>
    %3 = vector.shape_cast %2 : vector<1x1x32xf32> to vector<1x32xf32>
    %4 = vector.broadcast %3 : vector<1x32xf32> to vector<64x32xf32>
    %5 = arith.mulf %1, %4 : vector<64x32xf32>
    %c0_5 = arith.constant 0 : index
    %c0_6 = arith.constant 0 : index
    %c0_7 = arith.constant 0 : index
    %6 = vector.load %arg4[%c0_5, %c0_6, %c0_7] : memref<1x1x32xf32, #tpu.memory_space<vmem>>, vector<1x1x32xf32>
    %7 = vector.shape_cast %6 : vector<1x1x32xf32> to vector<1x32xf32>
    %8 = vector.broadcast %7 : vector<1x32xf32> to vector<64x32xf32>
    %9 = arith.addf %5, %8 : vector<64x32xf32>
    %10 = arith.truncf %9 : vector<64x32xf32> to vector<64x32xbf16>
    %c0_8 = arith.constant 0 : index
    %c0_9 = arith.constant 0 : index
    %11 = vector.load %arg5[%c0_8, %c0_9] : memref<32x96xbf16, #tpu.memory_space<vmem>>, vector<32x96xbf16>
    %cst = arith.constant dense<0.000000e+00> : vector<64x96xf32>
    %12 = tpu.matmul %10, %11, %cst {dimension_numbers = #tpu.dot_dimension_numbers<[1], [0], [0], [1], [0, 0, 1, 1], [], []>} : vector<64x32xbf16>, vector<32x96xbf16>, vector<64x96xf32> -> vector<64x96xf32>
    %c0_10 = arith.constant 0 : index
    %c0_11 = arith.constant 0 : index
    %13 = vector.load %arg6[%c0_10, %c0_11] : memref<1x96xf32, #tpu.memory_space<vmem>>, vector<1x96xf32>
    %14 = vector.broadcast %13 : vector<1x96xf32> to vector<64x96xf32>
    %15 = arith.addf %12, %14 : vector<64x96xf32>
    %16 = vector.extract_strided_slice %15 {offsets = [0, 0], sizes = [64, 32], strides = [1, 1]} : vector<64x96xf32> to vector<64x32xf32>
    %17 = arith.truncf %16 : vector<64x32xf32> to vector<64x32xbf16>
    %c0_12 = arith.constant 0 : index
    %c0_13 = arith.constant 0 : index
    %c0_14 = arith.constant 0 : index
    %18 = vector.load %arg7[%c0_12, %c0_13, %c0_14] : memref<1x64x32xbf16, #tpu.memory_space<vmem>>, vector<1x64x32xbf16>
    %19 = vector.shape_cast %18 : vector<1x64x32xbf16> to vector<64x32xbf16>
    %20 = vector.shape_cast %17 : vector<64x32xbf16> to vector<1x64x32xbf16>
    tpu.vector_store %arg7[%c0_12, %c0_13, %c0_14], %20 {strides = array<i32>} : memref<1x64x32xbf16, #tpu.memory_space<vmem>>, vector<1x64x32xbf16>,
    %21 = vector.extract_strided_slice %15 {offsets = [0, 32], sizes = [64, 32], strides = [1, 1]} : vector<64x96xf32> to vector<64x32xf32>
    %22 = arith.truncf %21 : vector<64x32xf32> to vector<64x32xbf16>
    %c0_15 = arith.constant 0 : index
    %c0_16 = arith.constant 0 : index
    %c0_17 = arith.constant 0 : index
    %23 = vector.load %arg8[%c0_15, %c0_16, %c0_17] : memref<1x64x32xbf16, #tpu.memory_space<vmem>>, vector<1x64x32xbf16>
    %24 = vector.shape_cast %23 : vector<1x64x32xbf16> to vector<64x32xbf16>
    %25 = vector.shape_cast %22 : vector<64x32xbf16> to vector<1x64x32xbf16>
    tpu.vector_store %arg8[%c0_15, %c0_16, %c0_17], %25 {strides = array<i32>} : memref<1x64x32xbf16, #tpu.memory_space<vmem>>, vector<1x64x32xbf16>,
    %26 = vector.extract_strided_slice %15 {offsets = [0, 64], sizes = [64, 32], strides = [1, 1]} : vector<64x96xf32> to vector<64x32xf32>
    %27 = arith.truncf %26 : vector<64x32xf32> to vector<64x32xbf16>
    %c0_18 = arith.constant 0 : index
    %c0_19 = arith.constant 0 : index
    %c0_20 = arith.constant 0 : index
    %28 = vector.load %arg9[%c0_18, %c0_19, %c0_20] : memref<1x64x32xbf16, #tpu.memory_space<vmem>>, vector<1x64x32xbf16>
    %29 = vector.shape_cast %28 : vector<1x64x32xbf16> to vector<64x32xbf16>
    %30 = vector.shape_cast %27 : vector<64x32xbf16> to vector<1x64x32xbf16>
    tpu.vector_store %arg9[%c0_18, %c0_19, %c0_20], %30 {strides = array<i32>} : memref<1x64x32xbf16, #tpu.memory_space<vmem>>, vector<1x64x32xbf16>,
    return
  }
  func.func @transform_0(%arg0: i32, %arg1: i32) -> (i32, i32, i32) {
    %c0_i32 = arith.constant 0 : i32
    %c0_i32_0 = arith.constant 0 : i32
    return %arg0, %arg1, %c0_i32 : i32, i32, i32
  }
  func.func @transform_1(%arg0: i32, %arg1: i32) -> (i32, i32, i32) {
    %c0_i32 = arith.constant 0 : i32
    %c0_i32_0 = arith.constant 0 : i32
    %c0_i32_1 = arith.constant 0 : i32
    return %arg0, %c0_i32, %c0_i32_0 : i32, i32, i32
  }
  func.func @transform_2(%arg0: i32, %arg1: i32) -> (i32, i32, i32) {
    %c0_i32 = arith.constant 0 : i32
    %c0_i32_0 = arith.constant 0 : i32
    %c0_i32_1 = arith.constant 0 : i32
    return %arg0, %c0_i32, %c0_i32_0 : i32, i32, i32
  }
  func.func @transform_3(%arg0: i32, %arg1: i32) -> (i32, i32) {
    %c0_i32 = arith.constant 0 : i32
    %c0_i32_0 = arith.constant 0 : i32
    %c0_i32_1 = arith.constant 0 : i32
    return %c0_i32, %c0_i32_0 : i32, i32
  }
  func.func @transform_4(%arg0: i32, %arg1: i32) -> (i32, i32) {
    %c0_i32 = arith.constant 0 : i32
    %c0_i32_0 = arith.constant 0 : i32
    %c0_i32_1 = arith.constant 0 : i32
    return %c0_i32, %c0_i32_0 : i32, i32
  }
  func.func @transform_5(%arg0: i32, %arg1: i32) -> (i32, i32, i32) {
    %c0_i32 = arith.constant 0 : i32
    %c0_i32_0 = arith.constant 0 : i32
    return %arg0, %arg1, %c0_i32 : i32, i32, i32
  }
  func.func @transform_6(%arg0: i32, %arg1: i32) -> (i32, i32, i32) {
    %c0_i32 = arith.constant 0 : i32
    %c0_i32_0 = arith.constant 0 : i32
    return %arg0, %arg1, %c0_i32 : i32, i32, i32
  }
  func.func @transform_7(%arg0: i32, %arg1: i32) -> (i32, i32, i32) {
    %c0_i32 = arith.constant 0 : i32
    %c0_i32_0 = arith.constant 0 : i32
    return %arg0, %arg1, %c0_i32 : i32, i32, i32
  }
}

module attributes {stable_mosaic.version = 11 : i64} {
  func.func @attn_kernel(%arg0: i32, %arg1: i32, %arg2: memref<1x64x32xf32, #tpu.memory_space<vmem>>, %arg3: memref<1x64x32xbf16, #tpu.memory_space<vmem>>, %arg4: memref<1x64x32xbf16, #tpu.memory_space<vmem>>, %arg5: memref<1x64x32xbf16, #tpu.memory_space<vmem>>, %arg6: memref<32x32xbf16, #tpu.memory_space<vmem>>, %arg7: memref<1x32xf32, #tpu.memory_space<vmem>>, %arg8: memref<1x64x32xf32, #tpu.memory_space<vmem>>) attributes {dimension_semantics = [#tpu.dimension_semantics<parallel>, #tpu.dimension_semantics<arbitrary>], iteration_bounds = array<i64: 2, 1>, scalar_prefetch = 0 : i64, scratch_operands = 0 : i64, tpu.core_type = #tpu.core_type<tc>, window_params = [{pipeline_mode = #tpu.pipeline_mode<synchronous>, transform_indices = @transform_0, window_bounds = array<i64: 1, 64, 32>}, {transform_indices = @transform_1, window_bounds = array<i64: 1, 64, 32>}, {transform_indices = @transform_2, window_bounds = array<i64: 1, 64, 32>}, {transform_indices = @transform_3, window_bounds = array<i64: 1, 64, 32>}, {pipeline_mode = #tpu.pipeline_mode<synchronous>, transform_indices = @transform_4, window_bounds = array<i64: 32, 32>}, {pipeline_mode = #tpu.pipeline_mode<synchronous>, transform_indices = @transform_5, window_bounds = array<i64: 1, 32>}, {transform_indices = @transform_6, window_bounds = array<i64: 1, 64, 32>}]} {
    %c0_i32 = arith.constant 0 : i32
    %0 = arith.cmpi eq, %arg1, %c0_i32 : i32
    %1 = arith.extui %0 : i1 to i32
    %c0_i32_0 = arith.constant 0 : i32
    %2 = arith.cmpi ne, %1, %c0_i32_0 : i32
    scf.if %2 {
      %cst_20 = arith.constant 0.000000e+00 : f32
      %33 = vector.broadcast %cst_20 : f32 to vector<1x64x32xf32>
      %c0_21 = arith.constant 0 : index
      %c0_22 = arith.constant 0 : index
      %c0_23 = arith.constant 0 : index
      %34 = vector.load %arg8[%c0_21, %c0_22, %c0_23] : memref<1x64x32xf32, #tpu.memory_space<vmem>>, vector<1x64x32xf32>
      tpu.vector_store %arg8[%c0_21, %c0_22, %c0_23], %33 {strides = array<i32>} : memref<1x64x32xf32, #tpu.memory_space<vmem>>, vector<1x64x32xf32>,
    } else {
    }
    %c0 = arith.constant 0 : index
    %c0_1 = arith.constant 0 : index
    %c0_2 = arith.constant 0 : index
    %3 = vector.load %arg3[%c0, %c0_1, %c0_2] : memref<1x64x32xbf16, #tpu.memory_space<vmem>>, vector<1x64x32xbf16>
    %4 = vector.shape_cast %3 : vector<1x64x32xbf16> to vector<64x32xbf16>
    %c0_3 = arith.constant 0 : index
    %c0_4 = arith.constant 0 : index
    %c0_5 = arith.constant 0 : index
    %5 = vector.load %arg4[%c0_3, %c0_4, %c0_5] : memref<1x64x32xbf16, #tpu.memory_space<vmem>>, vector<1x64x32xbf16>
    %6 = vector.shape_cast %5 : vector<1x64x32xbf16> to vector<64x32xbf16>
    %cst = arith.constant dense<0.000000e+00> : vector<64x64xf32>
    %7 = tpu.matmul %4, %6, %cst {dimension_numbers = #tpu.dot_dimension_numbers<[1], [1], [0], [0], [0, 0, 1, 0], [], []>} : vector<64x32xbf16>, vector<64x32xbf16>, vector<64x64xf32> -> vector<64x64xf32>
    %cst_6 = arith.constant dense<0xFF800000> : vector<64xf32>
    %8 = vector.multi_reduction <maximumf>, %7, %cst_6 [1] : vector<64x64xf32> to vector<64xf32>
    %9 = vector.shape_cast %8 : vector<64xf32> to vector<64x1xf32>
    %10 = vector.broadcast %9 : vector<64x1xf32> to vector<64x64xf32>
    %11 = arith.subf %7, %10 : vector<64x64xf32>
    %12 = math.exp %11 : vector<64x64xf32>
    %cst_7 = arith.constant dense<0.000000e+00> : vector<64xf32>
    %13 = vector.multi_reduction <add>, %12, %cst_7 [1] : vector<64x64xf32> to vector<64xf32>
    %14 = vector.shape_cast %13 : vector<64xf32> to vector<64x1xf32>
    %15 = tpu.reciprocal %14 {approx = true} : vector<64x1xf32> -> vector<64x1xf32>
    %c0_8 = arith.constant 0 : index
    %c0_9 = arith.constant 0 : index
    %c0_10 = arith.constant 0 : index
    %16 = vector.load %arg5[%c0_8, %c0_9, %c0_10] : memref<1x64x32xbf16, #tpu.memory_space<vmem>>, vector<1x64x32xbf16>
    %17 = vector.shape_cast %16 : vector<1x64x32xbf16> to vector<64x32xbf16>
    %18 = arith.extf %17 : vector<64x32xbf16> to vector<64x32xf32>
    %19 = vector.broadcast %15 : vector<64x1xf32> to vector<64x32xf32>
    %20 = arith.mulf %18, %19 : vector<64x32xf32>
    %21 = arith.truncf %20 : vector<64x32xf32> to vector<64x32xbf16>
    %22 = arith.truncf %12 : vector<64x64xf32> to vector<64x64xbf16>
    %cst_11 = arith.constant dense<0.000000e+00> : vector<64x32xf32>
    %23 = tpu.matmul %22, %21, %cst_11 {dimension_numbers = #tpu.dot_dimension_numbers<[0], [0], [1], [1], [0, 1, 1, 1], [], []>} : vector<64x64xbf16>, vector<64x32xbf16>, vector<64x32xf32> -> vector<64x32xf32>
    %c0_12 = arith.constant 0 : index
    %c0_13 = arith.constant 0 : index
    %c0_14 = arith.constant 0 : index
    %24 = vector.load %arg8[%c0_12, %c0_13, %c0_14] : memref<1x64x32xf32, #tpu.memory_space<vmem>>, vector<1x64x32xf32>
    %25 = vector.shape_cast %24 : vector<1x64x32xf32> to vector<64x32xf32>
    %26 = arith.addf %25, %23 : vector<64x32xf32>
    %c0_15 = arith.constant 0 : index
    %c0_16 = arith.constant 0 : index
    %c0_17 = arith.constant 0 : index
    %27 = vector.load %arg8[%c0_15, %c0_16, %c0_17] : memref<1x64x32xf32, #tpu.memory_space<vmem>>, vector<1x64x32xf32>
    %28 = vector.shape_cast %27 : vector<1x64x32xf32> to vector<64x32xf32>
    %29 = vector.shape_cast %26 : vector<64x32xf32> to vector<1x64x32xf32>
    tpu.vector_store %arg8[%c0_15, %c0_16, %c0_17], %29 {strides = array<i32>} : memref<1x64x32xf32, #tpu.memory_space<vmem>>, vector<1x64x32xf32>,
    %c0_i32_18 = arith.constant 0 : i32
    %30 = arith.cmpi eq, %arg1, %c0_i32_18 : i32
    %31 = arith.extui %30 : i1 to i32
    %c0_i32_19 = arith.constant 0 : i32
    %32 = arith.cmpi ne, %31, %c0_i32_19 : i32
    scf.if %32 {
      %c0_20 = arith.constant 0 : index
      %c0_21 = arith.constant 0 : index
      %c0_22 = arith.constant 0 : index
      %33 = vector.load %arg8[%c0_20, %c0_21, %c0_22] : memref<1x64x32xf32, #tpu.memory_space<vmem>>, vector<1x64x32xf32>
      %34 = vector.shape_cast %33 : vector<1x64x32xf32> to vector<64x32xf32>
      %35 = arith.truncf %34 : vector<64x32xf32> to vector<64x32xbf16>
      %c0_23 = arith.constant 0 : index
      %c0_24 = arith.constant 0 : index
      %36 = vector.load %arg6[%c0_23, %c0_24] : memref<32x32xbf16, #tpu.memory_space<vmem>>, vector<32x32xbf16>
      %cst_25 = arith.constant dense<0.000000e+00> : vector<64x32xf32>
      %37 = tpu.matmul %35, %36, %cst_25 {dimension_numbers = #tpu.dot_dimension_numbers<[1], [0], [0], [1], [0, 0, 1, 1], [], []>} : vector<64x32xbf16>, vector<32x32xbf16>, vector<64x32xf32> -> vector<64x32xf32>
      %c0_26 = arith.constant 0 : index
      %c0_27 = arith.constant 0 : index
      %38 = vector.load %arg7[%c0_26, %c0_27] : memref<1x32xf32, #tpu.memory_space<vmem>>, vector<1x32xf32>
      %39 = vector.broadcast %38 : vector<1x32xf32> to vector<64x32xf32>
      %40 = arith.addf %37, %39 : vector<64x32xf32>
      %c0_28 = arith.constant 0 : index
      %c0_29 = arith.constant 0 : index
      %c0_30 = arith.constant 0 : index
      %41 = vector.load %arg2[%c0_28, %c0_29, %c0_30] : memref<1x64x32xf32, #tpu.memory_space<vmem>>, vector<1x64x32xf32>
      %42 = vector.shape_cast %41 : vector<1x64x32xf32> to vector<64x32xf32>
      %43 = arith.addf %42, %40 : vector<64x32xf32>
      %c0_31 = arith.constant 0 : index
      %c0_32 = arith.constant 0 : index
      %c0_33 = arith.constant 0 : index
      %44 = vector.load %arg8[%c0_31, %c0_32, %c0_33] : memref<1x64x32xf32, #tpu.memory_space<vmem>>, vector<1x64x32xf32>
      %45 = vector.shape_cast %44 : vector<1x64x32xf32> to vector<64x32xf32>
      %46 = vector.shape_cast %43 : vector<64x32xf32> to vector<1x64x32xf32>
      tpu.vector_store %arg8[%c0_31, %c0_32, %c0_33], %46 {strides = array<i32>} : memref<1x64x32xf32, #tpu.memory_space<vmem>>, vector<1x64x32xf32>,
    } else {
    }
    return
  }
  func.func @transform_0(%arg0: i32, %arg1: i32) -> (i32, i32, i32) {
    %c0_i32 = arith.constant 0 : i32
    %c0_i32_0 = arith.constant 0 : i32
    %c0_i32_1 = arith.constant 0 : i32
    return %arg0, %c0_i32, %c0_i32_0 : i32, i32, i32
  }
  func.func @transform_1(%arg0: i32, %arg1: i32) -> (i32, i32, i32) {
    %c0_i32 = arith.constant 0 : i32
    %c0_i32_0 = arith.constant 0 : i32
    return %arg0, %arg1, %c0_i32 : i32, i32, i32
  }
  func.func @transform_2(%arg0: i32, %arg1: i32) -> (i32, i32, i32) {
    %c0_i32 = arith.constant 0 : i32
    %c0_i32_0 = arith.constant 0 : i32
    %c0_i32_1 = arith.constant 0 : i32
    return %arg0, %c0_i32, %c0_i32_0 : i32, i32, i32
  }
  func.func @transform_3(%arg0: i32, %arg1: i32) -> (i32, i32, i32) {
    %c0_i32 = arith.constant 0 : i32
    %c0_i32_0 = arith.constant 0 : i32
    return %arg0, %arg1, %c0_i32 : i32, i32, i32
  }
  func.func @transform_4(%arg0: i32, %arg1: i32) -> (i32, i32) {
    %c0_i32 = arith.constant 0 : i32
    %c0_i32_0 = arith.constant 0 : i32
    %c0_i32_1 = arith.constant 0 : i32
    return %c0_i32, %c0_i32_0 : i32, i32
  }
  func.func @transform_5(%arg0: i32, %arg1: i32) -> (i32, i32) {
    %c0_i32 = arith.constant 0 : i32
    %c0_i32_0 = arith.constant 0 : i32
    %c0_i32_1 = arith.constant 0 : i32
    return %c0_i32, %c0_i32_0 : i32, i32
  }
  func.func @transform_6(%arg0: i32, %arg1: i32) -> (i32, i32, i32) {
    %c0_i32 = arith.constant 0 : i32
    %c0_i32_0 = arith.constant 0 : i32
    %c0_i32_1 = arith.constant 0 : i32
    return %arg0, %c0_i32, %c0_i32_0 : i32, i32, i32
  }
}

module attributes {stable_mosaic.version = 11 : i64} {
  func.func @gn_stats_kernel(%arg0: i32, %arg1: i32, %arg2: memref<1x64x32xf32, #tpu.memory_space<vmem>>, %arg3: memref<1x32xf32, #tpu.memory_space<vmem>>, %arg4: memref<1x32xf32, #tpu.memory_space<vmem>>, %arg5: memref<32x8xf32, #tpu.memory_space<vmem>>, %arg6: memref<8x32xf32, #tpu.memory_space<vmem>>, %arg7: memref<1x1x32xf32, #tpu.memory_space<vmem>>, %arg8: memref<1x1x32xf32, #tpu.memory_space<vmem>>) attributes {dimension_semantics = [#tpu.dimension_semantics<parallel>, #tpu.dimension_semantics<arbitrary>], iteration_bounds = array<i64: 2, 1>, scalar_prefetch = 0 : i64, scratch_operands = 0 : i64, tpu.core_type = #tpu.core_type<tc>, window_params = [{transform_indices = @transform_0, window_bounds = array<i64: 1, 64, 32>}, {pipeline_mode = #tpu.pipeline_mode<synchronous>, transform_indices = @transform_1, window_bounds = array<i64: 1, 32>}, {pipeline_mode = #tpu.pipeline_mode<synchronous>, transform_indices = @transform_2, window_bounds = array<i64: 1, 32>}, {pipeline_mode = #tpu.pipeline_mode<synchronous>, transform_indices = @transform_3, window_bounds = array<i64: 32, 8>}, {pipeline_mode = #tpu.pipeline_mode<synchronous>, transform_indices = @transform_4, window_bounds = array<i64: 8, 32>}, {transform_indices = @transform_5, window_bounds = array<i64: 1, 1, 32>}, {transform_indices = @transform_6, window_bounds = array<i64: 1, 1, 32>}]} {
    %c0_i32 = arith.constant 0 : i32
    %0 = arith.cmpi eq, %arg1, %c0_i32 : i32
    %1 = arith.extui %0 : i1 to i32
    %c0_i32_0 = arith.constant 0 : i32
    %2 = arith.cmpi ne, %1, %c0_i32_0 : i32
    scf.if %2 {
      %cst_18 = arith.constant 0.000000e+00 : f32
      %25 = vector.broadcast %cst_18 : f32 to vector<1x1x32xf32>
      %c0_19 = arith.constant 0 : index
      %c0_20 = arith.constant 0 : index
      %c0_21 = arith.constant 0 : index
      %26 = vector.load %arg7[%c0_19, %c0_20, %c0_21] : memref<1x1x32xf32, #tpu.memory_space<vmem>>, vector<1x1x32xf32>
      tpu.vector_store %arg7[%c0_19, %c0_20, %c0_21], %25 {strides = array<i32>} : memref<1x1x32xf32, #tpu.memory_space<vmem>>, vector<1x1x32xf32>,
      %cst_22 = arith.constant 0.000000e+00 : f32
      %27 = vector.broadcast %cst_22 : f32 to vector<1x1x32xf32>
      %c0_23 = arith.constant 0 : index
      %c0_24 = arith.constant 0 : index
      %c0_25 = arith.constant 0 : index
      %28 = vector.load %arg8[%c0_23, %c0_24, %c0_25] : memref<1x1x32xf32, #tpu.memory_space<vmem>>, vector<1x1x32xf32>
      tpu.vector_store %arg8[%c0_23, %c0_24, %c0_25], %27 {strides = array<i32>} : memref<1x1x32xf32, #tpu.memory_space<vmem>>, vector<1x1x32xf32>,
    } else {
    }
    %c0 = arith.constant 0 : index
    %c0_1 = arith.constant 0 : index
    %c0_2 = arith.constant 0 : index
    %3 = vector.load %arg2[%c0, %c0_1, %c0_2] : memref<1x64x32xf32, #tpu.memory_space<vmem>>, vector<1x64x32xf32>
    %4 = vector.shape_cast %3 : vector<1x64x32xf32> to vector<64x32xf32>
    %c0_3 = arith.constant 0 : index
    %c0_4 = arith.constant 0 : index
    %c0_5 = arith.constant 0 : index
    %5 = vector.load %arg7[%c0_3, %c0_4, %c0_5] : memref<1x1x32xf32, #tpu.memory_space<vmem>>, vector<1x1x32xf32>
    %6 = vector.shape_cast %5 : vector<1x1x32xf32> to vector<1x32xf32>
    %cst = arith.constant dense<0.000000e+00> : vector<32xf32>
    %7 = vector.multi_reduction <add>, %4, %cst [0] : vector<64x32xf32> to vector<32xf32>
    %8 = vector.shape_cast %7 : vector<32xf32> to vector<1x32xf32>
    %9 = arith.addf %6, %8 : vector<1x32xf32>
    %c0_6 = arith.constant 0 : index
    %c0_7 = arith.constant 0 : index
    %c0_8 = arith.constant 0 : index
    %10 = vector.load %arg7[%c0_6, %c0_7, %c0_8] : memref<1x1x32xf32, #tpu.memory_space<vmem>>, vector<1x1x32xf32>
    %11 = vector.shape_cast %10 : vector<1x1x32xf32> to vector<1x32xf32>
    %12 = vector.shape_cast %9 : vector<1x32xf32> to vector<1x1x32xf32>
    tpu.vector_store %arg7[%c0_6, %c0_7, %c0_8], %12 {strides = array<i32>} : memref<1x1x32xf32, #tpu.memory_space<vmem>>, vector<1x1x32xf32>,
    %c0_9 = arith.constant 0 : index
    %c0_10 = arith.constant 0 : index
    %c0_11 = arith.constant 0 : index
    %13 = vector.load %arg8[%c0_9, %c0_10, %c0_11] : memref<1x1x32xf32, #tpu.memory_space<vmem>>, vector<1x1x32xf32>
    %14 = vector.shape_cast %13 : vector<1x1x32xf32> to vector<1x32xf32>
    %15 = arith.mulf %4, %4 : vector<64x32xf32>
    %cst_12 = arith.constant dense<0.000000e+00> : vector<32xf32>
    %16 = vector.multi_reduction <add>, %15, %cst_12 [0] : vector<64x32xf32> to vector<32xf32>
    %17 = vector.shape_cast %16 : vector<32xf32> to vector<1x32xf32>
    %18 = arith.addf %14, %17 : vector<1x32xf32>
    %c0_13 = arith.constant 0 : index
    %c0_14 = arith.constant 0 : index
    %c0_15 = arith.constant 0 : index
    %19 = vector.load %arg8[%c0_13, %c0_14, %c0_15] : memref<1x1x32xf32, #tpu.memory_space<vmem>>, vector<1x1x32xf32>
    %20 = vector.shape_cast %19 : vector<1x1x32xf32> to vector<1x32xf32>
    %21 = vector.shape_cast %18 : vector<1x32xf32> to vector<1x1x32xf32>
    tpu.vector_store %arg8[%c0_13, %c0_14, %c0_15], %21 {strides = array<i32>} : memref<1x1x32xf32, #tpu.memory_space<vmem>>, vector<1x1x32xf32>,
    %c0_i32_16 = arith.constant 0 : i32
    %22 = arith.cmpi eq, %arg1, %c0_i32_16 : i32
    %23 = arith.extui %22 : i1 to i32
    %c0_i32_17 = arith.constant 0 : i32
    %24 = arith.cmpi ne, %23, %c0_i32_17 : i32
    scf.if %24 {
      %c0_18 = arith.constant 0 : index
      %c0_19 = arith.constant 0 : index
      %c0_20 = arith.constant 0 : index
      %25 = vector.load %arg7[%c0_18, %c0_19, %c0_20] : memref<1x1x32xf32, #tpu.memory_space<vmem>>, vector<1x1x32xf32>
      %26 = vector.shape_cast %25 : vector<1x1x32xf32> to vector<1x32xf32>
      %c0_21 = arith.constant 0 : index
      %c0_22 = arith.constant 0 : index
      %c0_23 = arith.constant 0 : index
      %27 = vector.load %arg8[%c0_21, %c0_22, %c0_23] : memref<1x1x32xf32, #tpu.memory_space<vmem>>, vector<1x1x32xf32>
      %28 = vector.shape_cast %27 : vector<1x1x32xf32> to vector<1x32xf32>
      %c0_24 = arith.constant 0 : index
      %c0_25 = arith.constant 0 : index
      %29 = vector.load %arg5[%c0_24, %c0_25] : memref<32x8xf32, #tpu.memory_space<vmem>>, vector<32x8xf32>
      %cst_26 = arith.constant dense<0.000000e+00> : vector<1x8xf32>
      %30 = tpu.matmul %26, %29, %cst_26 {dimension_numbers = #tpu.dot_dimension_numbers<[1], [0], [0], [1], [0, 0, 1, 1], [], []>} : vector<1x32xf32>, vector<32x8xf32>, vector<1x8xf32> -> vector<1x8xf32>
      %cst_27 = arith.constant 2.560000e+02 : f32
      %31 = vector.broadcast %cst_27 : f32 to vector<1x8xf32>
      %32 = arith.divf %30, %31 : vector<1x8xf32>
      %c0_28 = arith.constant 0 : index
      %c0_29 = arith.constant 0 : index
      %33 = vector.load %arg5[%c0_28, %c0_29] : memref<32x8xf32, #tpu.memory_space<vmem>>, vector<32x8xf32>
      %cst_30 = arith.constant dense<0.000000e+00> : vector<1x8xf32>
      %34 = tpu.matmul %28, %33, %cst_30 {dimension_numbers = #tpu.dot_dimension_numbers<[1], [0], [0], [1], [0, 0, 1, 1], [], []>} : vector<1x32xf32>, vector<32x8xf32>, vector<1x8xf32> -> vector<1x8xf32>
      %cst_31 = arith.constant 2.560000e+02 : f32
      %35 = vector.broadcast %cst_31 : f32 to vector<1x8xf32>
      %36 = arith.divf %34, %35 : vector<1x8xf32>
      %37 = arith.mulf %32, %32 : vector<1x8xf32>
      %38 = arith.subf %36, %37 : vector<1x8xf32>
      %cst_32 = arith.constant 0.000000e+00 : f32
      %39 = vector.broadcast %cst_32 : f32 to vector<1x8xf32>
      %40 = arith.maximumf %38, %39 : vector<1x8xf32>
      %cst_33 = arith.constant 9.99999997E-7 : f32
      %41 = vector.broadcast %cst_33 : f32 to vector<1x8xf32>
      %42 = arith.addf %40, %41 : vector<1x8xf32>
      %43 = math.rsqrt %42 : vector<1x8xf32>
      %c0_34 = arith.constant 0 : index
      %c0_35 = arith.constant 0 : index
      %44 = vector.load %arg6[%c0_34, %c0_35] : memref<8x32xf32, #tpu.memory_space<vmem>>, vector<8x32xf32>
      %cst_36 = arith.constant dense<0.000000e+00> : vector<1x32xf32>
      %45 = tpu.matmul %32, %44, %cst_36 {dimension_numbers = #tpu.dot_dimension_numbers<[1], [0], [0], [1], [0, 0, 1, 1], [], []>} : vector<1x8xf32>, vector<8x32xf32>, vector<1x32xf32> -> vector<1x32xf32>
      %c0_37 = arith.constant 0 : index
      %c0_38 = arith.constant 0 : index
      %46 = vector.load %arg6[%c0_37, %c0_38] : memref<8x32xf32, #tpu.memory_space<vmem>>, vector<8x32xf32>
      %cst_39 = arith.constant dense<0.000000e+00> : vector<1x32xf32>
      %47 = tpu.matmul %43, %46, %cst_39 {dimension_numbers = #tpu.dot_dimension_numbers<[1], [0], [0], [1], [0, 0, 1, 1], [], []>} : vector<1x8xf32>, vector<8x32xf32>, vector<1x32xf32> -> vector<1x32xf32>
      %c0_40 = arith.constant 0 : index
      %c0_41 = arith.constant 0 : index
      %48 = vector.load %arg3[%c0_40, %c0_41] : memref<1x32xf32, #tpu.memory_space<vmem>>, vector<1x32xf32>
      %49 = arith.mulf %48, %47 : vector<1x32xf32>
      %c0_42 = arith.constant 0 : index
      %c0_43 = arith.constant 0 : index
      %50 = vector.load %arg4[%c0_42, %c0_43] : memref<1x32xf32, #tpu.memory_space<vmem>>, vector<1x32xf32>
      %51 = arith.mulf %45, %49 : vector<1x32xf32>
      %52 = arith.subf %50, %51 : vector<1x32xf32>
      %c0_44 = arith.constant 0 : index
      %c0_45 = arith.constant 0 : index
      %c0_46 = arith.constant 0 : index
      %53 = vector.load %arg7[%c0_44, %c0_45, %c0_46] : memref<1x1x32xf32, #tpu.memory_space<vmem>>, vector<1x1x32xf32>
      %54 = vector.shape_cast %53 : vector<1x1x32xf32> to vector<1x32xf32>
      %55 = vector.shape_cast %49 : vector<1x32xf32> to vector<1x1x32xf32>
      tpu.vector_store %arg7[%c0_44, %c0_45, %c0_46], %55 {strides = array<i32>} : memref<1x1x32xf32, #tpu.memory_space<vmem>>, vector<1x1x32xf32>,
      %c0_47 = arith.constant 0 : index
      %c0_48 = arith.constant 0 : index
      %c0_49 = arith.constant 0 : index
      %56 = vector.load %arg8[%c0_47, %c0_48, %c0_49] : memref<1x1x32xf32, #tpu.memory_space<vmem>>, vector<1x1x32xf32>
      %57 = vector.shape_cast %56 : vector<1x1x32xf32> to vector<1x32xf32>
      %58 = vector.shape_cast %52 : vector<1x32xf32> to vector<1x1x32xf32>
      tpu.vector_store %arg8[%c0_47, %c0_48, %c0_49], %58 {strides = array<i32>} : memref<1x1x32xf32, #tpu.memory_space<vmem>>, vector<1x1x32xf32>,
    } else {
    }
    return
  }
  func.func @transform_0(%arg0: i32, %arg1: i32) -> (i32, i32, i32) {
    %c0_i32 = arith.constant 0 : i32
    %c0_i32_0 = arith.constant 0 : i32
    return %arg0, %arg1, %c0_i32 : i32, i32, i32
  }
  func.func @transform_1(%arg0: i32, %arg1: i32) -> (i32, i32) {
    %c0_i32 = arith.constant 0 : i32
    %c0_i32_0 = arith.constant 0 : i32
    %c0_i32_1 = arith.constant 0 : i32
    return %c0_i32, %c0_i32_0 : i32, i32
  }
  func.func @transform_2(%arg0: i32, %arg1: i32) -> (i32, i32) {
    %c0_i32 = arith.constant 0 : i32
    %c0_i32_0 = arith.constant 0 : i32
    %c0_i32_1 = arith.constant 0 : i32
    return %c0_i32, %c0_i32_0 : i32, i32
  }
  func.func @transform_3(%arg0: i32, %arg1: i32) -> (i32, i32) {
    %c0_i32 = arith.constant 0 : i32
    %c0_i32_0 = arith.constant 0 : i32
    %c0_i32_1 = arith.constant 0 : i32
    return %c0_i32, %c0_i32_0 : i32, i32
  }
  func.func @transform_4(%arg0: i32, %arg1: i32) -> (i32, i32) {
    %c0_i32 = arith.constant 0 : i32
    %c0_i32_0 = arith.constant 0 : i32
    %c0_i32_1 = arith.constant 0 : i32
    return %c0_i32, %c0_i32_0 : i32, i32
  }
  func.func @transform_5(%arg0: i32, %arg1: i32) -> (i32, i32, i32) {
    %c0_i32 = arith.constant 0 : i32
    %c0_i32_0 = arith.constant 0 : i32
    %c0_i32_1 = arith.constant 0 : i32
    return %arg0, %c0_i32, %c0_i32_0 : i32, i32, i32
  }
  func.func @transform_6(%arg0: i32, %arg1: i32) -> (i32, i32, i32) {
    %c0_i32 = arith.constant 0 : i32
    %c0_i32_0 = arith.constant 0 : i32
    %c0_i32_1 = arith.constant 0 : i32
    return %arg0, %c0_i32, %c0_i32_0 : i32, i32, i32
  }
}

</mosaic_0001>

<bundles_post_ra>
// kernel: _attn_block_pallas_impl.3
= control target key start
LH: loop header
LB: loop body
LE: loop exit
PB: predicated region body
PF: predicated region fallthrough
CT: control target
= control target key end

     0   :  { %s925_s21 = smov 0   ;;  %s927_s22 = smov 0   ;;  %s1042_s0 = inlined_call_operand.vmem [shape: f32[2,64,32], index: 0, kind: input, shape index: {}]   ;;  %s1043_s1 = inlined_call_operand.vmem [shape: f32[1,32], index: 1, kind: input, shape index: {}]   ;;  %s1044_s2 = inlined_call_operand.vmem [shape: f32[1,32], index: 2, kind: input, shape index: {}]   ;;  %s1045_s3 = inlined_call_operand.vmem [shape: f32[32,8], index: 3, kind: input, shape index: {}]   ;;  %s1046_s4 = inlined_call_operand.vmem [shape: f32[8,32], index: 4, kind: input, shape index: {}]   ;;  %s1047_s5 = inlined_call_operand.vmem [shape: f32[2,1,32], index: 5, kind: output, shape index: {0}]   ;;  %s1048_s6 = inlined_call_operand.vmem [shape: f32[2,1,32], index: 6, kind: output, shape index: {1}]  }
   0x1   :  { %s929_s23 = smov 0  }
   0x2 LB: > { %s29_s24 = sadd.s32 1, %s881_s22  ;;  %p766_p0 = scmp.ge.s32.totalorder %s885_s23, 1  ;;  %s885_s23 = sphi %s929_s23, %s17_s23   ;;  %s881_s22 = sphi %s927_s22, %s1050_s22   ;;  %s877_s21 = sphi %s925_s21, %s1049_s21  }
   0x3   : > { %p31_p1 = scmp.ge.s32.totalorder %s29_s24, 2  ;;  %p234_p2 = scmp.lt.s32.totalorder %s885_s23, 3 }
   0x5   : > { %s1052_s24 = smov (%p31_p1, %s29_s24), 0  ;;  %p235_p3 = pnand %p766_p0, %p234_p2 }
   0x6   : > { %v363_v0 = vld [vmem:[%s1045_s3] sm:$0xff] (!%p235_p3)  ;;  %v364_v1 = vld [vmem:[%s1045_s3 + $0x8] sm:$0xff] (!%p235_p3)  ;;  %v365_v2 = vld [vmem:[%s1045_s3 + $0x10] sm:$0xff] (!%p235_p3)  ;;  %v887_v3 = vmov (!%p235_p3), 0.0|0.0   ;;  %p270_p4 = scmp.lt.s32.totalorder (!%p235_p3), %s877_s21, 1  ;;  %vm888_vm0 = vmmov (!%p235_p3), 0  }
   0x7   : > { %238 = sbr.rel (%p235_p3) target bundleno = 508 (0x1fc), region = 40  ;;  %822 = vmatprep.subr.bf16.mxu0 (!%p235_p3), %v887_v3  ;;  %v823_v4 = vpack.c.bf16 (!%p235_p3), %v364_v1, %v363_v0  ;;  %828 = vmatprep.subr.bf16.mxu1 (!%p235_p3), %v887_v3  ;;  %v366_v5 = vld [vmem:[%s1045_s3 + $0x18] sm:$0xff] (!%p235_p3)  ;;  %v889_v6 = vmov (!%p235_p3), 0.0   ;;  %vm289_vm1 = vcmask (!%p235_p3), 253952   ;;  %vm301_vm2 = vcmask (!%p235_p3), 261120  }
   0x8   : > { %798 = vmatprep.mubr.msk.f32.mxu0 (!%p235_p3), %vm888_vm0, %v889_v6  ;;  %809 = vmatprep.mubr.msk.f32.mxu1 (!%p235_p3), %vm888_vm0, %v889_v6  ;;  %v826_v7 = vpack.c.bf16 (!%p235_p3), %v366_v5, %v365_v2  ;;  %vm522_vm3 = vcmask (!%p235_p3), 64512  }
   0x9   : > { %824 = vmatpush3.bf16.msra.mxu0 (!%p235_p3), %v823_v4  ;;  %830 = vmatpush3.bf16.msra.mxu1 (!%p235_p3), %v823_v4 }
   0xa   : > { %825 = vmatprep.subr.bf16.mxu0 (!%p235_p3), %v887_v3  ;;  %831 = vmatprep.subr.bf16.mxu1 (!%p235_p3), %v887_v3 }
   0xd   : > { %827 = vmatpush3.bf16.msra.mxu0 (!%p235_p3), %v826_v7  ;;  %833 = vmatpush3.bf16.msra.mxu1 (!%p235_p3), %v826_v7 }
   0xe   : > { %s1054_s21 = smov (!%p270_p4, %s877_s21), 1  ;;  %812 = vmatprep.subr.mxu0 %v889_v6  ;;  %817 = vmatprep.subr.mxu1 %v889_v6 }
   0xf   : > { %s775_s9 = sshll.u32 %s1054_s21, 6  ;;  %s962_s12 = scalar_lea.vmem %s1047_s5, %s1054_s21 }
  0x10   : > { %s967_s15 = scalar_lea.vmem %s1042_s0, %s775_s9  ;;  %290 = vst.msk [vmem:[%s962_s12] sm:$0x1] %vm289_vm1, %v889_v6  ;;  %s975_s18 = scalar_lea.vmem %s1048_s6, %s1054_s21 }
  0x11   : > { %v292_v8 = vld [vmem:[%s967_s15] sm:$0xff]  ;;  %v293_v9 = vld [vmem:[%s967_s15 + $0x8] sm:$0xff]  ;;  %v294_v10 = vld [vmem:[%s967_s15 + $0x10] sm:$0xff]  ;;  %291 = vst.msk [vmem:[%s975_s18] sm:$0x1] %vm289_vm1, %v889_v6 }
  0x12   : > { %v295_v11 = vld [vmem:[%s967_s15 + $0x18] sm:$0xff]  ;;  %v302_v12 = vsel %vm301_vm2, %v292_v8, 0.0  ;;  %v303_v13 = vsel %vm301_vm2, %v293_v9, 0.0  ;;  %v305_v14 = vsel %vm301_vm2, %v294_v10, 0.0  ;;  %v327_v15 = vmul.f32 %v292_v8, %v292_v8  ;;  %v296_v16 = vld [vmem:[%s967_s15 + $0x20] sm:$0xff]  ;;  %v297_v21 = vld [vmem:[%s967_s15 + $0x28] sm:$0xff] }
  0x13   : > { %v304_v17 = vadd.f32 %v303_v13, %v302_v12  ;;  %v307_v18 = vsel %vm301_vm2, %v295_v11, 0.0  ;;  %v328_v19 = vmul.f32 %v293_v9, %v293_v9  ;;  %v329_v20 = vmul.f32 %v294_v10, %v294_v10  ;;  %v298_v28 = vld [vmem:[%s967_s15 + $0x30] sm:$0xff]  ;;  %v299_v35 = vld [vmem:[%s967_s15 + $0x38] sm:$0xff]  ;;  %v521_v9 = vld [vmem:[%s1046_s4] sm:$0xff] }
  0x14   : > { %v330_v23 = vmul.f32 %v295_v11, %v295_v11  ;;  %v335_v24 = vsel %vm301_vm2, %v327_v15, 0.0  ;;  %v309_v25 = vsel %vm301_vm2, %v296_v16, 0.0  ;;  %v331_v27 = vmul.f32 %v296_v16, %v296_v16 }
  0x15   : > { %v306_v22 = vadd.f32 %v305_v14, %v304_v17  ;;  %v336_v26 = vsel %vm301_vm2, %v328_v19, 0.0  ;;  %v338_v31 = vsel %vm301_vm2, %v329_v20, 0.0  ;;  %v311_v32 = vsel %vm301_vm2, %v297_v21, 0.0 }
  0x16   : > { %v337_v30 = vadd.f32 %v336_v26, %v335_v24  ;;  %v332_v33 = vmul.f32 %v297_v21, %v297_v21  ;;  %v340_v34 = vsel %vm301_vm2, %v330_v23, 0.0  ;;  %v313_v38 = vsel %vm301_vm2, %v298_v28, 0.0  ;;  %v671_v26 = vld [vmem:[%s1044_s2] sm:$0x1] }
  0x17   : > { %v308_v29 = vadd.f32 %v307_v18, %v306_v22  ;;  %v333_v39 = vmul.f32 %v298_v28, %v298_v28  ;;  %v342_v40 = vsel %vm301_vm2, %v331_v27, 0.0  ;;  %v315_v43 = vsel %vm301_vm2, %v299_v35, 0.0  ;;  %v300_v62 = vld [vmem:[%s962_s12] sm:$0x1] }
  0x18   : > { %v339_v37 = vadd.f32 %v338_v31, %v337_v30  ;;  %v334_v44 = vmul.f32 %v299_v35, %v299_v35  ;;  %v344_v45 = vsel %vm301_vm2, %v332_v33, 0.0  ;;  %v326_v3 = vld [vmem:[%s975_s18] sm:$0x1] }
  0x19   : > { %v310_v36 = vadd.f32 %v309_v25, %v308_v29  ;;  %v346_v48 = vsel %vm301_vm2, %v333_v39, 0.0  ;;  %v669_v22 = vld [vmem:[%s1043_s1] sm:$0x1] }
  0x1a   : > { %v341_v42 = vadd.f32 %v340_v34, %v339_v37  ;;  %v348_v51 = vsel %vm301_vm2, %v334_v44, 0.0 }
  0x1b   : > { %v312_v41 = vadd.f32 %v311_v32, %v310_v36 }
  0x1c   : > { %v343_v47 = vadd.f32 %v342_v40, %v341_v42 }
  0x1d   : > { %v314_v46 = vadd.f32 %v313_v38, %v312_v41 }
  0x1e   : > { %v345_v50 = vadd.f32 %v344_v45, %v343_v47 }
  0x1f   : > { %v316_v49 = vadd.f32 %v315_v43, %v314_v46 }
  0x20   : > { %v347_v53 = vadd.f32 %v346_v48, %v345_v50 }
  0x21   : > { %v317_v52 = vrot.slane %v316_v49, 4 }
  0x22   : > { %v349_v55 = vadd.f32 %v348_v51, %v347_v53 }
  0x23   : > { %v318_v54 = vadd.f32 %v317_v52, %v316_v49 }
  0x24   : > { %v350_v57 = vrot.slane %v349_v55, 4 }
  0x25   : > { %v319_v56 = vrot.slane %v318_v54, 2 }
  0x26   : > { %v351_v59 = vadd.f32 %v350_v57, %v349_v55 }
  0x27   : > { %v320_v58 = vadd.f32 %v319_v56, %v318_v54 }
  0x28   : > { %v352_v61 = vrot.slane %v351_v59, 2 }
  0x29   : > { %v321_v60 = vrot.slane %v320_v58, 1 }
  0x2a   : > { %v353_v0 = vadd.f32 %v352_v61, %v351_v59 }
  0x2b   : > { %v322_v63 = vadd.f32 %v321_v60, %v320_v58 }
  0x2c   : > { %v354_v2 = vrot.slane %v353_v0, 1 }
  0x2d   : > { %v323_v1 = vadd.f32 %v322_v63, %v300_v62 }
  0x2e   : > { %v355_v4 = vadd.f32 %v354_v2, %v353_v0 }
  0x2f   : > { %325 = vst.msk [vmem:[%s962_s12] sm:$0x1] %vm289_vm1, %v323_v1 }
  0x30   : > { %v356_v5 = vadd.f32 %v355_v4, %v326_v3 }
  0x32   : > { %357 = vst.msk [vmem:[%s975_s18] sm:$0x1] %vm289_vm1, %v356_v5 }
  0x36   : > { %v361_v7 = vld [vmem:[%s962_s12] sm:$0x1] }
  0x37   : > { %799 = vmatmul.mubr.msk.f32.vlgmr.msra.gmra.mrb[0].mxu0 %vm301_vm2, %v361_v7 }
  0x38   : > { %814 = vmatprep.mubr.msk.f32.mxu0 %vm888_vm0, %v889_v6  ;;  %813 = vmatpush3.msra.mxu0 %v521_v9 }
  0x39   : > { %v362_v8 = vld [vmem:[%s975_s18] sm:$0x1] }
  0x3a   : > { %810 = vmatmul.mubr.msk.f32.vlgmr.msra.gmra.mrb[0].mxu1 %vm301_vm2, %v362_v8 }
  0x3b   : > { %819 = vmatprep.mubr.msk.f32.mxu1 %vm888_vm0, %v889_v6  ;;  %818 = vmatpush3.msra.mxu1 %v521_v9 }
 0x10a   : > { %v436_v10 = vpop.f32.mrb[0].mxu0 }
 0x10b   : > { %v441_v11 = vmul.f32 0.00390625, %v436_v10  ;;  %v800_v12 = vpop.f32.mrb[1].mxu0 }
 0x10d   : > { %v516_v13 = vmul.f32 %v441_v11, %v441_v11  ;;  %815 = vmatmul.mubr.msk.f32.vlgmr.msra.gmra.mrb[2].mxu0 %vm522_vm3, %v441_v11  ;;  %v511_v14 = vpop.f32.mrb[0].mxu1 }
 0x10e   : > { %v515_v15 = vmul.f32 0.00390625, %v511_v14  ;;  %v811_v16 = vpop.f32.mrb[1].mxu1 }
 0x110   : > { %v517_v17 = vsub.f32 %v515_v15, %v516_v13 }
 0x112   : > { %v518_v18 = vmax.f32 %v517_v17, 0.0 }
 0x114   : > { %v519_v6 = vadd.f32 1e-06, %v518_v18 }
 0x116   : > { %861 = vrsqrt.f32 %v519_v6 }
 0x120   : > { %v862_v19 = vpop.eup %861 }
 0x121   : > { %820 = vmatmul.mubr.msk.f32.vlgmr.msra.gmra.mrb[2].mxu1 %vm522_vm3, %v862_v19 }
 0x1e0   : > { %v592_v20 = vpop.f32.mrb[2].mxu0 }
 0x1e1   : > { %v816_v21 = vpop.f32.mrb[3].mxu0 }
 0x1f4   : > { %v665_v23 = vpop.f32.mrb[2].mxu1 }
 0x1f5   : > { %v670_v24 = vmul.f32 %v669_v22, %v665_v23  ;;  %v821_v25 = vpop.f32.mrb[3].mxu1 }
 0x1f7   : > { %v672_v27 = vmul.f32 %v670_v24, %v592_v20  ;;  %674 = vst.msk [vmem:[%s962_s12] sm:$0x1] %vm289_vm1, %v670_v24 }
 0x1f9   : > { %v673_v28 = vsub.f32 %v671_v26, %v672_v27 }
 0x1fb   : > { %675 = vst.msk [vmem:[%s975_s18] sm:$0x1] %vm289_vm1, %v673_v28 }
 0x1fc PF: > { %s17_s23 = sadd.s32 1, %s885_s23   ;;  %s1049_s21 = smov %s881_s22 }
 0x1fd   : > { %p14_p5 = scmp.ge.s32.totalorder %s17_s23, 4   ;;  %s1050_s22 = smov %s1052_s24 }
 0x1ff   :  { %16 = sbr.rel (!%p14_p5) target bundleno = 2 (0x2), region = 90 }

// kernel: _attn_block_pallas_impl.4
= control target key start
LH: loop header
LB: loop body
LE: loop exit
PB: predicated region body
PF: predicated region fallthrough
CT: control target
= control target key end

     0   :  { %s1007_s24 = smov 0   ;;  %s1009_s25 = smov 0   ;;  %s1110_s0 = inlined_call_operand.vmem [shape: f32[2,64,32], index: 0, kind: input, shape index: {}]   ;;  %s1111_s1 = inlined_call_operand.vmem [shape: f32[2,1,32], index: 1, kind: input, shape index: {}]   ;;  %s1112_s2 = inlined_call_operand.vmem [shape: f32[2,1,32], index: 2, kind: input, shape index: {}]   ;;  %s1113_s3 = inlined_call_operand.vmem [shape: bf16[32,96], index: 3, kind: input, shape index: {}]   ;;  %s1114_s4 = inlined_call_operand.vmem [shape: f32[1,96], index: 4, kind: input, shape index: {}]   ;;  %s1115_s5 = inlined_call_operand.vmem [shape: bf16[2,64,32], index: 5, kind: output, shape index: {0}]   ;;  %s1116_s6 = inlined_call_operand.vmem [shape: bf16[2,64,32], index: 6, kind: output, shape index: {1}]   ;;  %s1117_s7 = inlined_call_operand.vmem [shape: bf16[2,64,32], index: 7, kind: output, shape index: {2}]  }
   0x1   :  { %s1011_s26 = smov 0  }
   0x2 LB: > { %s30_s27 = sadd.s32 1, %s959_s25  ;;  %p851_p0 = scmp.ge.s32.totalorder %s963_s26, 1  ;;  %s963_s26 = sphi %s1011_s26, %s18_s26   ;;  %s959_s25 = sphi %s1009_s25, %s1119_s25   ;;  %s955_s24 = sphi %s1007_s24, %s1118_s24  }
   0x3   : > { %p32_p1 = scmp.ge.s32.totalorder %s30_s27, 2  ;;  %p283_p2 = scmp.lt.s32.totalorder %s963_s26, 3 }
   0x5   : > { %s1121_s27 = smov (%p32_p1, %s30_s27), 0  ;;  %p284_p3 = pnand %p851_p0, %p283_p2 }
   0x6   : > { %v939_v0 = vld [vmem:[%s1113_s3] sm:$0xff] (!%p284_p3)   ;;  %p348_p4 = scmp.lt.s32.totalorder (!%p284_p3), %s955_s24, 1  ;;  %v940_v1 = vld [vmem:[%s1113_s3 + $0x8] sm:$0xff] (!%p284_p3)   ;;  %vm459_vm0 = vcmask (!%p284_p3), 261120   ;;  %vm569_vm1 = vcmask (!%p284_p3), 257024   ;;  %s966_s29 = smov (!%p284_p3), 64  }
   0x7   : > { %287 = sbr.rel (%p284_p3) target bundleno = 387 (0x183), region = 40  ;;  %897 = vmatprep.subr.bf16.mxu0 (!%p284_p3), %v939_v0  ;;  %909 = vmatprep.subr.bf16.mxu1 (!%p284_p3), %v939_v0  ;;  %v862_v32 = vld [vmem:[%s1114_s4] ss:$0 sm:$0xff] (!%p284_p3) }
   0x8   : > { %898 = vmatpush3.bf16.msra.mxu0 (!%p284_p3), %v939_v0  ;;  %911 = vmatpush3.bf16.msra.mxu1 (!%p284_p3), %v939_v0 }
   0x9   : > { %899 = vmatprep.subr.bf16.mxu0 (!%p284_p3), %v940_v1  ;;  %910 = vmatprep.subr.bf16.mxu1 (!%p284_p3), %v940_v1 }
   0xc   : > { %900 = vmatpush3.bf16.msra.mxu0 (!%p284_p3), %v940_v1  ;;  %912 = vmatpush3.bf16.msra.mxu1 (!%p284_p3), %v940_v1 }
   0xe   : > { %s1123_s24 = smov (!%p348_p4, %s955_s24), 1 }
   0xf   : > { %s879_s9 = sshll.u32 %s1123_s24, 6  ;;  %s359_s12 = scalar_lea.vmem %s1111_s1, %s1123_s24 }
  0x10   : > { %s355_s15 = scalar_lea.vmem %s1110_s0, %s879_s9  ;;  %s362_s18 = scalar_lea.vmem %s1112_s2, %s1123_s24  ;;  %v860_v2 = vld [vmem:[%s359_s12] ss:$0 sm:$0xff] }
  0x11   : > { %v394_v3 = vld [vmem:[%s355_s15] sm:$0xff]  ;;  %v395_v4 = vld [vmem:[%s355_s15 + $0x8] sm:$0xff]  ;;  %v396_v10 = vld [vmem:[%s355_s15 + $0x10] sm:$0xff]  ;;  %s1053_s21 = sshll.u32 %s1123_s24, 5  ;;  %s965_s24 = smov 96  }
  0x12   : > { %v861_v5 = vld [vmem:[%s362_s18] ss:$0 sm:$0xff]  ;;  %v409_v6 = vmul.f32 %v860_v2, %v394_v3  ;;  %v410_v7 = vmul.f32 %v860_v2, %v395_v4  ;;  %v399_v9 = vld [vmem:[%s355_s15 + $0x28] sm:$0xff]  ;;  %v397_v13 = vld [vmem:[%s355_s15 + $0x18] sm:$0xff]  ;;  %v411_v14 = vmul.f32 %v860_v2, %v396_v10  ;;  %s1059_s28 = scalar_lea.vmem %s1115_s5, %s1053_s21  ;;  %s381_s9 = scalar_lea.vmem %s1116_s6, %s1053_s21 }
  0x13   : > { %v398_v8 = vld [vmem:[%s355_s15 + $0x20] sm:$0xff]  ;;  %v414_v12 = vmul.f32 %v860_v2, %v399_v9  ;;  %v400_v15 = vld [vmem:[%s355_s15 + $0x30] sm:$0xff]  ;;  %v401_v16 = vld [vmem:[%s355_s15 + $0x38] sm:$0xff]  ;;  %v412_v19 = vmul.f32 %v860_v2, %v397_v13  ;;  %s391_s12 = scalar_lea.vmem %s1117_s7, %s1053_s21 }
  0x14   : > { %v413_v11 = vmul.f32 %v860_v2, %v398_v8  ;;  %v424_v17 = vadd.f32 %v861_v5, %v409_v6  ;;  %v425_v18 = vadd.f32 %v861_v5, %v410_v7  ;;  %v415_v20 = vmul.f32 %v860_v2, %v400_v15 }
  0x15   : > { %v429_v22 = vadd.f32 %v861_v5, %v414_v12  ;;  %v426_v23 = vadd.f32 %v861_v5, %v411_v14  ;;  %v416_v24 = vmul.f32 %v860_v2, %v401_v16  ;;  %v427_v26 = vadd.f32 %v861_v5, %v412_v19 }
  0x16   : > { %v428_v21 = vadd.f32 %v861_v5, %v413_v11  ;;  %v432_v25 = vpack.c.bf16 %v425_v18, %v424_v17  ;;  %v430_v27 = vadd.f32 %v861_v5, %v415_v20 }
  0x17   : > { %v431_v29 = vadd.f32 %v861_v5, %v416_v24  ;;  %v433_v30 = vpack.c.bf16 %v427_v26, %v426_v23 }
  0x18   : > { %v434_v28 = vpack.c.bf16 %v429_v22, %v428_v21  ;;  %901 = vmatprep.mubr.msk.bf16.mxu0 %vm459_vm0, %v432_v25 }
  0x19   : > { %v435_v31 = vpack.c.bf16 %v431_v29, %v430_v27  ;;  %902 = vmatmul.mubr.msk.bf16.vlgmr.msra.gmra.mrb[0].mxu0 %vm459_vm0, %v433_v30 }
  0x1a   : > { %905 = vmatprep.mubr.msk.bf16.mxu1 %vm459_vm0, %v434_v28 }
  0x1b   : > { %906 = vmatmul.mubr.msk.bf16.vlgmr.msra.gmra.mrb[0].mxu1 %vm459_vm0, %v435_v31 }
  0xec   : > { %v903_v33 = vpop.f32.mrb[0].mxu0 }
  0xed   : > { %v515_v34 = vadd.f32 %v903_v33, %v862_v32  ;;  %v506_v36 = vpop.f32.mrb[1].mxu0 }
  0xee   : > { %v907_v35 = vpop.f32.mrb[0].mxu1  ;;  %v507_v38 = vadd.f32 %v862_v32, %v506_v36  ;;  %v904_v40 = vpop.f32.mrb[2].mxu0 }
  0xef   : > { %v531_v37 = vadd.f32 %v907_v35, %v862_v32  ;;  %v522_v39 = vpop.f32.mrb[1].mxu1  ;;  %v885_v41 = vpack.c.bf16 %v515_v34, %v515_v34  ;;  %v518_v43 = vadd.f32 %v904_v40, %v862_v32  ;;  %v509_v45 = vpop.f32.mrb[3].mxu0 }
  0xf0   : > { %v523_v42 = vadd.f32 %v862_v32, %v522_v39  ;;  %v908_v44 = vpop.f32.mrb[2].mxu1  ;;  %v883_v47 = vpack.c.bf16 %v507_v38, %v507_v38  ;;  %v510_v49 = vadd.f32 %v862_v32, %v509_v45 }
  0xf1   : > { %v889_v46 = vpack.c.bf16 %v531_v37, %v531_v37  ;;  %v534_v48 = vadd.f32 %v908_v44, %v862_v32  ;;  %v525_v50 = vpop.f32.mrb[3].mxu1  ;;  %572 = vst.msk [vmem:[%s1059_s28 + $0x8] sm:$0xf] %vm569_vm1, %v885_v41  ;;  %v886_v52 = vpack.c.bf16 %v518_v43, %v518_v43  ;;  %582 = vrot.lane.b32.xlu1 %v885_v41, %s965_s24 }
  0xf2   : > { %v887_v51 = vpack.c.bf16 %v523_v42, %v523_v42  ;;  %v526_v53 = vadd.f32 %v862_v32, %v525_v50  ;;  %570 = vst.msk [vmem:[%s1059_s28] sm:$0xf] %vm569_vm1, %v883_v47  ;;  %v884_v55 = vpack.c.bf16 %v510_v49, %v510_v49 }
  0xf3   : > { %576 = vst.msk [vmem:[%s1059_s28 + $0x18] sm:$0xf] %vm569_vm1, %v889_v46  ;;  %v890_v54 = vpack.c.bf16 %v534_v48, %v534_v48  ;;  %590 = vrot.lane.b32.xlu0 %v889_v46, %s965_s24  ;;  %573 = vst.msk [vmem:[%s1059_s28 + $0xc] sm:$0xf] %vm569_vm1, %v886_v52 }
  0xf4   : > { %574 = vst.msk [vmem:[%s1059_s28 + $0x10] sm:$0xf] %vm569_vm1, %v887_v51  ;;  %v888_v56 = vpack.c.bf16 %v526_v53, %v526_v53  ;;  %571 = vst.msk [vmem:[%s1059_s28 + $0x4] sm:$0xf] %vm569_vm1, %v884_v55 }
  0xf5   : > { %577 = vst.msk [vmem:[%s1059_s28 + $0x1c] sm:$0xf] %vm569_vm1, %v890_v54  ;;  %584 = vrot.lane.b32.xlu1 %v886_v52, %s965_s24 }
  0xf6   : > { %575 = vst.msk [vmem:[%s1059_s28 + $0x14] sm:$0xf] %vm569_vm1, %v888_v56 }
  0xf7   : > { %614 = vrot.lane.b32.xlu0 %v885_v41, %s966_s29 }
  0xf9   : > { %592 = vrot.lane.b32.xlu1 %v890_v54, %s965_s24 }
  0xfb   : > { %578 = vrot.lane.b32.xlu0 %v883_v47, %s965_s24 }
  0xfd   : > { %616 = vrot.lane.b32.xlu1 %v886_v52, %s966_s29 }
  0xff   : > { %586 = vrot.lane.b32.xlu0 %v887_v51, %s965_s24 }
 0x101   : > { %588 = vrot.lane.b32.xlu1 %v888_v56, %s965_s24 }
 0x103   : > { %610 = vrot.lane.b32.xlu0 %v883_v47, %s966_s29 }
 0x105   : > { %612 = vrot.lane.b32.xlu1 %v884_v55, %s966_s29 }
 0x107   : > { %618 = vrot.lane.b32.xlu0 %v887_v51, %s966_s29 }
 0x109   : > { %620 = vrot.lane.b32.xlu1 %v888_v56, %s966_s29 }
 0x10b   : > { %580 = vrot.lane.b32.xlu0 %v884_v55, %s965_s24 }
 0x10d   : > { %624 = vrot.lane.b32.xlu1 %v890_v54, %s966_s29 }
 0x10f   : > { %622 = vrot.lane.b32.xlu0 %v889_v46, %s966_s29 }
 0x163   : > { %v583_v57 = vpop.permute.xlu1 %582 }
 0x164   : > { %604 = vst.msk [vmem:[%s381_s9 + $0x8] sm:$0xf] %vm569_vm1, %v583_v57 }
 0x165   : > { %v591_v58 = vpop.permute.xlu0 %590 }
 0x166   : > { %608 = vst.msk [vmem:[%s381_s9 + $0x18] sm:$0xf] %vm569_vm1, %v591_v58 }
 0x167   : > { %v585_v59 = vpop.permute.xlu1 %584 }
 0x168   : > { %605 = vst.msk [vmem:[%s381_s9 + $0xc] sm:$0xf] %vm569_vm1, %v585_v59 }
 0x169   : > { %v615_v60 = vpop.permute.xlu0 %614 }
 0x16a   : > { %636 = vst.msk [vmem:[%s391_s12 + $0x8] sm:$0xf] %vm569_vm1, %v615_v60 }
 0x16b   : > { %v593_v61 = vpop.permute.xlu1 %592 }
 0x16c   : > { %609 = vst.msk [vmem:[%s381_s9 + $0x1c] sm:$0xf] %vm569_vm1, %v593_v61 }
 0x16d   : > { %v579_v62 = vpop.permute.xlu0 %578 }
 0x16e   : > { %602 = vst.msk [vmem:[%s381_s9] sm:$0xf] %vm569_vm1, %v579_v62 }
 0x16f   : > { %v617_v63 = vpop.permute.xlu1 %616 }
 0x170   : > { %637 = vst.msk [vmem:[%s391_s12 + $0xc] sm:$0xf] %vm569_vm1, %v617_v63 }
 0x171   : > { %v587_v0 = vpop.permute.xlu0 %586 }
 0x172   : > { %606 = vst.msk [vmem:[%s381_s9 + $0x10] sm:$0xf] %vm569_vm1, %v587_v0 }
 0x173   : > { %v589_v1 = vpop.permute.xlu1 %588 }
 0x174   : > { %607 = vst.msk [vmem:[%s381_s9 + $0x14] sm:$0xf] %vm569_vm1, %v589_v1 }
 0x175   : > { %v611_v2 = vpop.permute.xlu0 %610 }
 0x176   : > { %634 = vst.msk [vmem:[%s391_s12] sm:$0xf] %vm569_vm1, %v611_v2 }
 0x177   : > { %v613_v3 = vpop.permute.xlu1 %612 }
 0x178   : > { %635 = vst.msk [vmem:[%s391_s12 + $0x4] sm:$0xf] %vm569_vm1, %v613_v3 }
 0x179   : > { %v619_v4 = vpop.permute.xlu0 %618 }
 0x17a   : > { %638 = vst.msk [vmem:[%s391_s12 + $0x10] sm:$0xf] %vm569_vm1, %v619_v4 }
 0x17b   : > { %v621_v5 = vpop.permute.xlu1 %620 }
 0x17c   : > { %639 = vst.msk [vmem:[%s391_s12 + $0x14] sm:$0xf] %vm569_vm1, %v621_v5 }
 0x17d   : > { %v581_v6 = vpop.permute.xlu0 %580 }
 0x17e   : > { %603 = vst.msk [vmem:[%s381_s9 + $0x4] sm:$0xf] %vm569_vm1, %v581_v6 }
 0x17f   : > { %v625_v7 = vpop.permute.xlu1 %624 }
 0x180   : > { %641 = vst.msk [vmem:[%s391_s12 + $0x1c] sm:$0xf] %vm569_vm1, %v625_v7 }
 0x181   : > { %v623_v8 = vpop.permute.xlu0 %622 }
 0x182   : > { %640 = vst.msk [vmem:[%s391_s12 + $0x18] sm:$0xf] %vm569_vm1, %v623_v8 }
 0x183 PF: > { %s18_s26 = sadd.s32 1, %s963_s26   ;;  %s1118_s24 = smov %s959_s25 }
 0x184   : > { %p15_p5 = scmp.ge.s32.totalorder %s18_s26, 4   ;;  %s1119_s25 = smov %s1121_s27 }
 0x186   :  { %17 = sbr.rel (!%p15_p5) target bundleno = 2 (0x2), region = 100 }

// kernel: _attn_block_pallas_impl.5
= control target key start
LH: loop header
LB: loop body
LE: loop exit
PB: predicated region body
PF: predicated region fallthrough
CT: control target
= control target key end

     0   :  { %s1262_s21 = smov 0   ;;  %s1264_s22 = smov 0   ;;  %s1434_s0 = inlined_call_operand.vmem [shape: f32[2,64,32], index: 0, kind: input, shape index: {}, may-alias: {0,6}]   ;;  %s1435_s1 = inlined_call_operand.vmem [shape: bf16[2,64,32], index: 1, kind: input, shape index: {}]   ;;  %s1436_s2 = inlined_call_operand.vmem [shape: bf16[2,64,32], index: 2, kind: input, shape index: {}]   ;;  %s1437_s3 = inlined_call_operand.vmem [shape: bf16[2,64,32], index: 3, kind: input, shape index: {}]   ;;  %s1438_s4 = inlined_call_operand.vmem [shape: bf16[32,32], index: 4, kind: input, shape index: {}]   ;;  %s1439_s5 = inlined_call_operand.vmem [shape: f32[1,32], index: 5, kind: input, shape index: {}]   ;;  %s1440_s6 = inlined_call_operand.vmem [shape: f32[2,64,32], index: 6, kind: output, shape index: {}, may-alias: {0,6}]  }
   0x1   :  { %s1266_s23 = smov 0  }
   0x2 LB: > { %s28_s24 = sadd.s32 1, %s1220_s22  ;;  %p1004_p0 = scmp.ge.s32.totalorder %s1224_s23, 1  ;;  %s1224_s23 = sphi %s1266_s23, %s16_s23   ;;  %s1220_s22 = sphi %s1264_s22, %s1442_s22   ;;  %s1216_s21 = sphi %s1262_s21, %s1441_s21  }
   0x3   : > { %p30_p1 = scmp.ge.s32.totalorder %s28_s24, 2  ;;  %p268_p2 = scmp.lt.s32.totalorder %s1224_s23, 3 }
   0x5   : > { %s1444_s24 = smov (%p30_p1, %s28_s24), 0  ;;  %p269_p3 = pnand %p1004_p0, %p268_p2 }
   0x6   : > { %p321_p4 = scmp.lt.s32.totalorder (!%p269_p3), %s1216_s21, 1  ;;  %vm361_vm0 = vcmask (!%p269_p3), 261120   ;;  %vm516_vm1 = vcmask (!%p269_p3), 523264  }
   0x7   : > { %272 = sbr.rel (%p269_p3) target bundleno = 1059 (0x423), region = 44 }
   0xe   : > { %s1446_s21 = smov (!%p321_p4, %s1216_s21), 1 }
   0xf   : > { %s1283_s25 = sshll.u32 %s1446_s21, 5  ;;  %s1040_s8 = sshll.u32 %s1446_s21, 6 }
  0x10   : > { %s340_s28 = scalar_lea.vmem %s1436_s2, %s1283_s25  ;;  %s334_s7 = scalar_lea.vmem %s1435_s1, %s1283_s25 }
  0x11   : > { %v1160_v0 = vld [vmem:[%s340_s28] sm:$0xff]   ;;  %v1161_v1 = vld [vmem:[%s340_s28 + $0x8] sm:$0xff]   ;;  %v1162_v5 = vld [vmem:[%s340_s28 + $0x10] sm:$0xff]   ;;  %s1327_s11 = scalar_lea.vmem %s1440_s6, %s1040_s8  ;;  %s1349_s14 = scalar_lea.vmem %s1437_s3, %s1283_s25 }
  0x12   : > { %1130 = vmatprep.subr.msk.bf16.mxu0 %vm361_vm0, %v1160_v0  ;;  %v440_v2 = vsel %vm361_vm0, %v1160_v0, 0  ;;  %v1164_v3 = vld [vmem:[%s334_s7] sm:$0xff]   ;;  %v443_v4 = vsel %vm361_vm0, %v1161_v1, 0  ;;  %v446_v6 = vsel %vm361_vm0, %v1162_v5, 0  ;;  %v1163_v7 = vld [vmem:[%s340_s28 + $0x18] sm:$0xff]   ;;  %v1165_v9 = vld [vmem:[%s334_s7 + $0x8] sm:$0xff]   ;;  %s325_s27 = scalar_lea.vmem %s1434_s0, %s1040_s8 }
  0x13   : > { %1087 = vmatpush3.bf16.xpose.msra.mxu0 %v440_v2  ;;  %1094 = vmatprep.mubr.msk.bf16.mxu0 %vm361_vm0, %v1164_v3  ;;  %v449_v8 = vsel %vm361_vm0, %v1163_v7, 0  ;;  %v1166_v10 = vld [vmem:[%s334_s7 + $0x10] sm:$0xff]   ;;  %v1167_v11 = vld [vmem:[%s334_s7 + $0x18] sm:$0xff]  }
  0x14   : > { %1131 = vmatprep.subr.msk.bf16.mxu0 %vm361_vm0, %v1161_v1 }
  0x1b   : > { %1089 = vmatpush3.bf16.xpose.msra.mxu0 %v443_v4 }
  0x1c   : > { %1132 = vmatprep.subr.msk.bf16.mxu0 %vm361_vm0, %v1162_v5 }
  0x23   : > { %1091 = vmatpush3.bf16.xpose.msra.mxu0 %v446_v6 }
  0x24   : > { %1133 = vmatprep.subr.msk.bf16.mxu0 %vm361_vm0, %v1163_v7 }
  0x2b   : > { %1093 = vmatpush3.bf16.xpose.msra.mxu0 %v449_v8  ;;  %v1226_v8 = vmov 0.0  }
  0x2c   : > { %364 = vst.msk [vmem:[%s1327_s11 + $0x10] sm:$0xff] %vm361_vm0, %v1226_v8  ;;  %362 = vst.msk [vmem:[%s1327_s11] sm:$0xff] %vm361_vm0, %v1226_v8 }
  0x2d   : > { %363 = vst.msk [vmem:[%s1327_s11 + $0x8] sm:$0xff] %vm361_vm0, %v1226_v8  ;;  %365 = vst.msk [vmem:[%s1327_s11 + $0x18] sm:$0xff] %vm361_vm0, %v1226_v8 }
  0x2e   : > { %366 = vst.msk [vmem:[%s1327_s11 + $0x20] sm:$0xff] %vm361_vm0, %v1226_v8  ;;  %367 = vst.msk [vmem:[%s1327_s11 + $0x28] sm:$0xff] %vm361_vm0, %v1226_v8 }
  0x2f   : > { %368 = vst.msk [vmem:[%s1327_s11 + $0x30] sm:$0xff] %vm361_vm0, %v1226_v8  ;;  %369 = vst.msk [vmem:[%s1327_s11 + $0x38] sm:$0xff] %vm361_vm0, %v1226_v8 }
  0x32   : > { %1095 = vmatmul.mubr.msk.bf16.vlgmr.msra.gmra.mrb[0].mxu0 %vm361_vm0, %v1165_v9 }
  0x33   : > { %1098 = vmatprep.mubr.msk.bf16.mxu0 %vm361_vm0, %v1166_v10 }
  0x3a   : > { %1099 = vmatmul.mubr.msk.bf16.gmra.mrb[4].mxu0 %vm361_vm0, %v1167_v11 }
 0x105   : > { %v1096_v12 = vpop.f32.mrb[0].mxu0 }
 0x106   : > { %v485_v13 = vpop.f32.mrb[1].mxu0  ;;  %v523_v14 = vsel %vm516_vm1, %v1096_v12, -inf }
 0x107   : > { %524 = vmax.xlane.f32.xlu1 %v523_v14  ;;  %v1097_v15 = vpop.f32.mrb[2].mxu0  ;;  %v517_v16 = vsel %vm516_vm1, %v485_v13, -inf }
 0x108   : > { %518 = vmax.xlane.f32.xlu0 %v517_v16  ;;  %v488_v17 = vpop.f32.mrb[3].mxu0  ;;  %v526_v18 = vsel %vm516_vm1, %v1097_v15, -inf }
 0x109   : > { %v520_v19 = vsel %vm516_vm1, %v488_v17, -inf }
 0x10b   : > { %527 = vmax.xlane.f32.xlu1 %v526_v18  ;;  %v1061_v18 = vld [vmem:[%s1349_s14 + $0x8] sm:$0xff]  }
 0x10c   : > { %521 = vmax.xlane.f32.xlu0 %v520_v19 }
 0x10d   : > { %v1100_v20 = vpop.f32.mrb[4].mxu0 }
 0x10e   : > { %v501_v21 = vpop.f32.mrb[5].mxu0  ;;  %v535_v26 = vsel %vm516_vm1, %v1100_v20, -inf }
 0x10f   : > { %v1101_v22 = vpop.f32.mrb[6].mxu0  ;;  %v529_v23 = vsel %vm516_vm1, %v501_v21, -inf }
 0x110   : > { %530 = vmax.xlane.f32.xlu0 %v529_v23  ;;  %v504_v24 = vpop.f32.mrb[7].mxu0  ;;  %v538_v27 = vsel %vm516_vm1, %v1101_v22, -inf }
 0x111   : > { %v532_v25 = vsel %vm516_vm1, %v504_v24, -inf }
 0x112   : > { %533 = vmax.xlane.f32.xlu1 %v532_v25  ;;  %v1051_v25 = vunpack.c.l.bf16 %v1061_v18 }
 0x114   : > { %536 = vmax.xlane.f32.xlu0 %v535_v26  ;;  %v1052_v26 = vunpack.c.h.bf16 %v1061_v18 }
 0x116   : > { %539 = vmax.xlane.f32.xlu1 %v538_v27 }
 0x194   : > { %v525_v28 = vpop.xlane.xlu1 %524 }
 0x195   : > { %v543_v29 = vsub.f32 %v1096_v12, %v525_v28  ;;  %v519_v30 = vpop.xlane.xlu0 %518 }
 0x196   : > { %v541_v31 = vsub.f32 %v485_v13, %v519_v30  ;;  %v1046_v13 = vld [vmem:[%s1349_s14] sm:$0xff]  }
 0x197   : > { %v553_v32 = vmul.f32 1.442695, %v543_v29  ;;  %v1047_v14 = vunpack.c.l.bf16 %v1046_v13 }
 0x198   : > { %v549_v33 = vmul.f32 1.442695, %v541_v31  ;;  %v528_v34 = vpop.xlane.xlu1 %527 }
 0x199   : > { %1170 = vpow2.f32 %v553_v32  ;;  %v544_v35 = vsub.f32 %v1097_v15, %v528_v34  ;;  %v522_v36 = vpop.xlane.xlu0 %521  ;;  %v1062_v32 = vld [vmem:[%s1349_s14 + $0x10] sm:$0xff]  }
 0x19a   : > { %v542_v37 = vsub.f32 %v488_v17, %v522_v36  ;;  %1172 = vpow2.f32 %v549_v33  ;;  %v1048_v17 = vunpack.c.h.bf16 %v1046_v13  ;;  %v1055_v36 = vunpack.c.l.bf16 %v1062_v32 }
 0x19b   : > { %v555_v38 = vmul.f32 1.442695, %v544_v35  ;;  %v1063_v35 = vld [vmem:[%s1349_s14 + $0x18] sm:$0xff]  }
 0x19c   : > { %v551_v39 = vmul.f32 1.442695, %v542_v37  ;;  %v1056_v37 = vunpack.c.h.bf16 %v1062_v32 }
 0x19d   : > { %1174 = vpow2.f32 %v555_v38  ;;  %v531_v40 = vpop.xlane.xlu0 %530 }
 0x19e   : > { %1176 = vpow2.f32 %v551_v39  ;;  %v545_v41 = vsub.f32 %v501_v21, %v531_v40  ;;  %v1060_v39 = vunpack.c.h.bf16 %v1063_v35 }
 0x19f   : > { %v534_v42 = vpop.xlane.xlu1 %533 }
 0x1a0   : > { %v557_v43 = vmul.f32 1.442695, %v545_v41  ;;  %v546_v44 = vsub.f32 %v504_v24, %v534_v42  ;;  %v1059_v41 = vunpack.c.l.bf16 %v1063_v35 }
 0x1a1   : > { %v537_v45 = vpop.xlane.xlu0 %536 }
 0x1a2   : > { %v559_v46 = vmul.f32 1.442695, %v546_v44  ;;  %v547_v47 = vsub.f32 %v1100_v20, %v537_v45  ;;  %1178 = vpow2.f32 %v557_v43 }
 0x1a3   : > { %v1171_v48 = vpop.eup %1170  ;;  %v540_v49 = vpop.xlane.xlu1 %539 }
 0x1a4   : > { %1180 = vpow2.f32 %v559_v46  ;;  %v561_v50 = vmul.f32 1.442695, %v547_v47  ;;  %v548_v51 = vsub.f32 %v1101_v22, %v540_v49  ;;  %v571_v52 = vsel %vm516_vm1, %v1171_v48, 0.0  ;;  %v1173_v53 = vpop.eup %1172 }
 0x1a5   : > { %572 = vadd.xlane.f32.xlu0 %v571_v52  ;;  %v565_v57 = vsel %vm516_vm1, %v1173_v53, 0.0 }
 0x1a6   : > { %1182 = vpow2.f32 %v561_v50  ;;  %v563_v54 = vmul.f32 1.442695, %v548_v51 }
 0x1a7   : > { %v1175_v55 = vpop.eup %1174 }
 0x1a8   : > { %v1177_v56 = vpop.eup %1176  ;;  %1184 = vpow2.f32 %v563_v54  ;;  %v626_v58 = vpack.c.bf16 %v1175_v55, %v1171_v48  ;;  %v574_v62 = vsel %vm516_vm1, %v1175_v55, 0.0  ;;  %v1169_v54 = vld [vmem:[%s1438_s4 + $0x8] sm:$0xff]   ;;  %v724_v55 = vld [vmem:[%s1327_s11 + $0x10] sm:$0xff] }
 0x1a9   : > { %566 = vadd.xlane.f32.xlu0 %v565_v57  ;;  %v568_v59 = vsel %vm516_vm1, %v1177_v56, 0.0  ;;  %v625_v60 = vpack.c.bf16 %v1177_v56, %v1173_v53  ;;  %v1168_v53 = vld [vmem:[%s1438_s4] sm:$0xff]  }
 0x1aa   : > { %569 = vadd.xlane.f32.xlu1 %v568_v59  ;;  %v722_v56 = vld [vmem:[%s1327_s11] sm:$0xff] }
 0x1ac   : > { %v1179_v61 = vpop.eup %1178 }
 0x1ad   : > { %v577_v6 = vsel %vm516_vm1, %v1179_v61, 0.0 }
 0x1ae   : > { %v1181_v63 = vpop.eup %1180  ;;  %575 = vadd.xlane.f32.xlu1 %v574_v62 }
 0x1af   : > { %v627_v0 = vpack.c.bf16 %v1181_v63, %v1179_v61  ;;  %v580_v3 = vsel %vm516_vm1, %v1181_v63, 0.0  ;;  %v723_v61 = vld [vmem:[%s1327_s11 + $0x8] sm:$0xff] }
 0x1b0   : > { %v1183_v1 = vpop.eup %1182 }
 0x1b1   : > { %v583_v2 = vsel %vm516_vm1, %v1183_v1, 0.0 }
 0x1b2   : > { %v1185_v4 = vpop.eup %1184  ;;  %584 = vadd.xlane.f32.xlu0 %v583_v2  ;;  %581 = vadd.xlane.f32.xlu1 %v580_v3  ;;  %v728_v3 = vld [vmem:[%s1327_s11 + $0x30] sm:$0xff] }
 0x1b3   : > { %v628_v5 = vpack.c.bf16 %v1185_v4, %v1183_v1  ;;  %v586_v7 = vsel %vm516_vm1, %v1185_v4, 0.0  ;;  %v726_v4 = vld [vmem:[%s1327_s11 + $0x20] sm:$0xff] }
 0x1b6   : > { %578 = vadd.xlane.f32.xlu0 %v577_v6  ;;  %587 = vadd.xlane.f32.xlu1 %v586_v7  ;;  %v729_v6 = vld [vmem:[%s1327_s11 + $0x38] sm:$0xff] }
 0x1e3   : > { %629 = vxpose.xlu0.c.b16.start [1/4] (short) (narrow) %v625_v60, 64 }
 0x1e7   : > { %630 = vxpose.xlu0.c.b16.cont [2/4] (short) (narrow) %v626_v58, 64  ;;  %v725_v58 = vld [vmem:[%s1327_s11 + $0x18] sm:$0xff] }
 0x1eb   : > { %631 = vxpose.xlu0.c.b16.cont [3/4] (short) (narrow) %v627_v0, 64 }
 0x1ef   : > { %632 = vxpose.xlu0.c.b16.end [4/4] (short) (narrow) %v628_v5, 64 }
 0x232   : > { %v573_v9 = vpop.xlane.xlu0 %572 }
 0x236   : > { %v567_v10 = vpop.xlane.xlu0 %566 }
 0x237   : > { %1186 = vrcp.f32 %v567_v10  ;;  %v570_v11 = vpop.xlane.xlu1 %569 }
 0x238   : > { %1188 = vrcp.f32 %v570_v11 }
 0x239   : > { %1190 = vrcp.f32 %v573_v9  ;;  %v727_v9 = vld [vmem:[%s1327_s11 + $0x28] sm:$0xff] }
 0x23b   : > { %v576_v12 = vpop.xlane.xlu1 %575 }
 0x23c   : > { %1192 = vrcp.f32 %v576_v12 }
 0x23f   : > { %v585_v15 = vpop.xlane.xlu0 %584  ;;  %v582_v16 = vpop.xlane.xlu1 %581 }
 0x240   : > { %1194 = vrcp.f32 %v582_v16 }
 0x241   : > { %v1187_v19 = vpop.eup %1186  ;;  %1196 = vrcp.f32 %v585_v15 }
 0x242   : > { %v1189_v20 = vpop.eup %1188  ;;  %v613_v21 = vmul.f32 %v1187_v19, %v1047_v14 }
 0x243   : > { %v579_v22 = vpop.xlane.xlu0 %578  ;;  %v588_v23 = vpop.xlane.xlu1 %587  ;;  %v614_v24 = vmul.f32 %v1189_v20, %v1048_v17 }
 0x244   : > { %v1191_v27 = vpop.eup %1190  ;;  %1198 = vrcp.f32 %v579_v22 }
 0x245   : > { %1200 = vrcp.f32 %v588_v23  ;;  %v621_v28 = vpack.c.bf16 %v614_v24, %v613_v21  ;;  %v615_v30 = vmul.f32 %v1191_v27, %v1051_v25  ;;  %v1031_v27 = vld [vmem:[%s1439_s5] ss:$0 sm:$0xff] }
 0x246   : > { %v1193_v29 = vpop.eup %1192 }
 0x247   : > { %1102 = vmatprep.subr.bf16.mxu1 %v621_v28  ;;  %v616_v31 = vmul.f32 %v1193_v29, %v1052_v26 }
 0x248   : > { %1103 = vmatpush3.bf16.msra.mxu1 %v621_v28 }
 0x249   : > { %v622_v33 = vpack.c.bf16 %v616_v31, %v615_v30  ;;  %v637_v34 = vpop.trf.xlu0 }
 0x24a   : > { %1110 = vmatprep.mubr.msk.bf16.mxu1 %vm516_vm1, %v637_v34  ;;  %v1195_v38 = vpop.eup %1194 }
 0x24b   : > { %1104 = vmatprep.subr.bf16.mxu1 %v622_v33  ;;  %v1197_v40 = vpop.eup %1196  ;;  %v618_v45 = vmul.f32 %v1195_v38, %v1056_v37 }
 0x24c   : > { %1105 = vmatpush3.bf16.msra.mxu1 %v622_v33  ;;  %v619_v48 = vmul.f32 %v1197_v40, %v1059_v41 }
 0x24d   : > { %v638_v50 = vpop.trf.xlu0 }
 0x24e   : > { %v1199_v42 = vpop.eup %1198 }
 0x24f   : > { %v1201_v43 = vpop.eup %1200  ;;  %v617_v44 = vmul.f32 %v1199_v42, %v1055_v36 }
 0x250   : > { %v620_v46 = vmul.f32 %v1201_v43, %v1060_v39 }
 0x251   : > { %v623_v47 = vpack.c.bf16 %v618_v45, %v617_v44  ;;  %v639_v51 = vpop.trf.xlu0 }
 0x252   : > { %v624_v49 = vpack.c.bf16 %v620_v46, %v619_v48 }
 0x253   : > { %1106 = vmatprep.subr.bf16.mxu1 %v623_v47 }
 0x254   : > { %1107 = vmatpush3.bf16.msra.mxu1 %v623_v47 }
 0x255   : > { %1108 = vmatprep.subr.bf16.mxu1 %v624_v49  ;;  %v640_v52 = vpop.trf.xlu0 }
 0x258   : > { %1109 = vmatpush3.bf16.msra.mxu1 %v624_v49 }
 0x259   : > { %1118 = vmatprep.subr.bf16.mxu1 %v1168_v53 }
 0x25b   : > { %1111 = vmatmul.mubr.msk.bf16.vlgmr.msra.gmra.mrb[0].mxu1 %vm516_vm1, %v638_v50 }
 0x25c   : > { %1114 = vmatprep.mubr.msk.bf16.mxu1 %vm516_vm1, %v639_v51  ;;  %1119 = vmatpush3.bf16.msra.mxu1 %v1168_v53 }
 0x25d   : > { %1120 = vmatprep.subr.bf16.mxu1 %v1169_v54 }
 0x260   : > { %1121 = vmatpush3.bf16.msra.mxu1 %v1169_v54 }
 0x263   : > { %1115 = vmatmul.mubr.msk.bf16.gmra.mrb[4].mxu1 %vm516_vm1, %v640_v52 }
 0x32e   : > { %v1112_v57 = vpop.f32.mrb[0].mxu1 }
 0x32f   : > { %v732_v59 = vadd.f32 %v1112_v57, %v724_v55  ;;  %v691_v60 = vpop.f32.mrb[1].mxu1 }
 0x330   : > { %v730_v62 = vadd.f32 %v722_v56, %v691_v60  ;;  %v1113_v63 = vpop.f32.mrb[2].mxu1 }
 0x331   : > { %740 = vst.msk [vmem:[%s1327_s11 + $0x10] sm:$0xff] %vm361_vm0, %v732_v59  ;;  %v733_v0 = vadd.f32 %v1113_v63, %v725_v58  ;;  %v694_v1 = vpop.f32.mrb[3].mxu1 }
 0x332   : > { %738 = vst.msk [vmem:[%s1327_s11] sm:$0xff] %vm361_vm0, %v730_v62  ;;  %v731_v2 = vadd.f32 %v723_v61, %v694_v1 }
 0x333   : > { %741 = vst.msk [vmem:[%s1327_s11 + $0x18] sm:$0xff] %vm361_vm0, %v733_v0 }
 0x334   : > { %739 = vst.msk [vmem:[%s1327_s11 + $0x8] sm:$0xff] %vm361_vm0, %v731_v2 }
 0x336   : > { %v1116_v5 = vpop.f32.mrb[4].mxu1 }
 0x337   : > { %v736_v7 = vadd.f32 %v1116_v5, %v728_v3  ;;  %v707_v8 = vpop.f32.mrb[5].mxu1 }
 0x338   : > { %v734_v10 = vadd.f32 %v726_v4, %v707_v8  ;;  %v1117_v11 = vpop.f32.mrb[6].mxu1  ;;  %v751_v19 = vld [vmem:[%s1327_s11 + $0x10] sm:$0xff] }
 0x339   : > { %744 = vst.msk [vmem:[%s1327_s11 + $0x30] sm:$0xff] %vm361_vm0, %v736_v7  ;;  %v737_v12 = vadd.f32 %v1117_v11, %v729_v6  ;;  %v710_v13 = vpop.f32.mrb[7].mxu1  ;;  %v749_v16 = vld [vmem:[%s1327_s11] sm:$0xff] }
 0x33a   : > { %742 = vst.msk [vmem:[%s1327_s11 + $0x20] sm:$0xff] %vm361_vm0, %v734_v10  ;;  %v735_v14 = vadd.f32 %v727_v9, %v710_v13  ;;  %v752_v15 = vld [vmem:[%s1327_s11 + $0x18] sm:$0xff] }
 0x33b   : > { %745 = vst.msk [vmem:[%s1327_s11 + $0x38] sm:$0xff] %vm361_vm0, %v737_v12  ;;  %v750_v17 = vld [vmem:[%s1327_s11 + $0x8] sm:$0xff]  ;;  %v758_v20 = vpack.c.bf16 %v752_v15, %v751_v19 }
 0x33c   : > { %743 = vst.msk [vmem:[%s1327_s11 + $0x28] sm:$0xff] %vm361_vm0, %v735_v14  ;;  %v757_v18 = vpack.c.bf16 %v750_v17, %v749_v16 }
 0x33e   : > { %1122 = vmatprep.mubr.msk.bf16.mxu1 %vm361_vm0, %v757_v18 }
 0x33f   : > { %1123 = vmatmul.mubr.msk.bf16.vlgmr.msra.gmra.mrb[8].mxu1 %vm361_vm0, %v758_v20 }
 0x340   : > { %v755_v25 = vld [vmem:[%s1327_s11 + $0x30] sm:$0xff] }
 0x341   : > { %v753_v22 = vld [vmem:[%s1327_s11 + $0x20] sm:$0xff] }
 0x342   : > { %v756_v21 = vld [vmem:[%s1327_s11 + $0x38] sm:$0xff] }
 0x343   : > { %v754_v23 = vld [vmem:[%s1327_s11 + $0x28] sm:$0xff]  ;;  %v760_v26 = vpack.c.bf16 %v756_v21, %v755_v25  ;;  %v863_v31 = vld [vmem:[%s325_s27 + $0x10] sm:$0xff]  ;;  %v861_v33 = vld [vmem:[%s325_s27] sm:$0xff] }
 0x344   : > { %v759_v24 = vpack.c.bf16 %v754_v23, %v753_v22  ;;  %v864_v37 = vld [vmem:[%s325_s27 + $0x18] sm:$0xff]  ;;  %v862_v39 = vld [vmem:[%s325_s27 + $0x8] sm:$0xff]  ;;  %v867_v40 = vld [vmem:[%s325_s27 + $0x30] sm:$0xff] }
 0x345   : > { %v865_v43 = vld [vmem:[%s325_s27 + $0x20] sm:$0xff]  ;;  %v868_v44 = vld [vmem:[%s325_s27 + $0x38] sm:$0xff]  ;;  %v866_v45 = vld [vmem:[%s325_s27 + $0x28] sm:$0xff] }
 0x346   : > { %1126 = vmatprep.mubr.msk.bf16.mxu1 %vm361_vm0, %v759_v24 }
 0x347   : > { %1127 = vmatmul.mubr.msk.bf16.gmra.mrb[12].mxu1 %vm361_vm0, %v760_v26 }
 0x412   : > { %v1124_v28 = vpop.f32.mrb[8].mxu1 }
 0x413   : > { %v839_v29 = vadd.f32 %v1124_v28, %v1031_v27  ;;  %v830_v30 = vpop.f32.mrb[9].mxu1 }
 0x414   : > { %v831_v32 = vadd.f32 %v1031_v27, %v830_v30  ;;  %v1125_v34 = vpop.f32.mrb[10].mxu1 }
 0x415   : > { %v871_v35 = vadd.f32 %v863_v31, %v839_v29  ;;  %v842_v36 = vadd.f32 %v1125_v34, %v1031_v27  ;;  %v833_v38 = vpop.f32.mrb[11].mxu1 }
 0x416   : > { %v869_v41 = vadd.f32 %v861_v33, %v831_v32  ;;  %v834_v42 = vadd.f32 %v1031_v27, %v833_v38 }
 0x417   : > { %v872_v46 = vadd.f32 %v864_v37, %v842_v36  ;;  %879 = vst.msk [vmem:[%s1327_s11 + $0x10] sm:$0xff] %vm361_vm0, %v871_v35 }
 0x418   : > { %v870_v47 = vadd.f32 %v862_v39, %v834_v42  ;;  %877 = vst.msk [vmem:[%s1327_s11] sm:$0xff] %vm361_vm0, %v869_v41 }
 0x419   : > { %880 = vst.msk [vmem:[%s1327_s11 + $0x18] sm:$0xff] %vm361_vm0, %v872_v46 }
 0x41a   : > { %v1128_v48 = vpop.f32.mrb[12].mxu1  ;;  %878 = vst.msk [vmem:[%s1327_s11 + $0x8] sm:$0xff] %vm361_vm0, %v870_v47 }
 0x41b   : > { %v855_v49 = vadd.f32 %v1128_v48, %v1031_v27  ;;  %v846_v50 = vpop.f32.mrb[13].mxu1 }
 0x41c   : > { %v847_v51 = vadd.f32 %v1031_v27, %v846_v50  ;;  %v1129_v52 = vpop.f32.mrb[14].mxu1 }
 0x41d   : > { %v875_v53 = vadd.f32 %v867_v40, %v855_v49  ;;  %v858_v54 = vadd.f32 %v1129_v52, %v1031_v27  ;;  %v849_v55 = vpop.f32.mrb[15].mxu1 }
 0x41e   : > { %v873_v56 = vadd.f32 %v865_v43, %v847_v51  ;;  %v850_v57 = vadd.f32 %v1031_v27, %v849_v55 }
 0x41f   : > { %v876_v58 = vadd.f32 %v868_v44, %v858_v54  ;;  %883 = vst.msk [vmem:[%s1327_s11 + $0x30] sm:$0xff] %vm361_vm0, %v875_v53 }
 0x420   : > { %v874_v59 = vadd.f32 %v866_v45, %v850_v57  ;;  %881 = vst.msk [vmem:[%s1327_s11 + $0x20] sm:$0xff] %vm361_vm0, %v873_v56 }
 0x421   : > { %884 = vst.msk [vmem:[%s1327_s11 + $0x38] sm:$0xff] %vm361_vm0, %v876_v58 }
 0x422   : > { %882 = vst.msk [vmem:[%s1327_s11 + $0x28] sm:$0xff] %vm361_vm0, %v874_v59 }
 0x423 PF: > { %s16_s23 = sadd.s32 1, %s1224_s23   ;;  %s1441_s21 = smov %s1220_s22 }
 0x424   : > { %p13_p5 = scmp.ge.s32.totalorder %s16_s23, 4   ;;  %s1442_s22 = smov %s1444_s24 }
 0x426   :  { %15 = sbr.rel (!%p13_p5) target bundleno = 2 (0x2), region = 91 }

</bundles_post_ra>
